<compile_context>
chip_gen: v5e
topology: v5e:2x2
jax: 0.10.0
libtpu: 0.0.40
codegen_flags: <defaults>
</compile_context>

<pallas_src>
import functools

import numpy as np
import jax
import jax.numpy as jnp
from jax.experimental import pallas as pl
from jax.experimental.pallas import tpu as pltpu


# ---------------------------------------------------------------------------
# Host-side helpers (deterministic, run once per shape)
# ---------------------------------------------------------------------------
def _interp_pad_matrix(out_size, up_size, in_size, pad_before):
    """1-D operator (out_size, in_size): bilinear align_corners=True upsample
    from `in_size` to `up_size`, then F.pad-style placement with `pad_before`
    leading pad (negative => crop, matching torch.F.pad semantics)."""
    U = np.zeros((out_size, in_size), dtype=np.float32)
    for o in range(out_size):
        u = o - pad_before                      # index into the upsampled axis
        if u < 0 or u >= up_size:
            continue                            # zero-pad region
        if up_size == 1 or in_size == 1:
            U[o, 0] = 1.0
            continue
        src = u * (in_size - 1) / (up_size - 1)
        i0 = min(int(np.floor(src)), in_size - 1)
        i1 = min(i0 + 1, in_size - 1)
        w1 = src - i0
        U[o, i0] += 1.0 - w1
        U[o, i1] += w1
    return U


def _interp_matrix(out_size, in_size):
    """Plain align_corners=True interpolation matrix (used by the reference)."""
    return _interp_pad_matrix(out_size, out_size, in_size, 0)


# ---------------------------------------------------------------------------
# Fused kernel: upsample + pad + concat + (conv3x3 -> BN -> ReLU) * 2
# ---------------------------------------------------------------------------
def _up_fused_kernel(x1_ref, x2_ref, uw_ref, mask_ref,
                     w1_ref, b1_ref, w2_ref, b2_ref,
                     o_ref, pad1f, pad2f, *, H, W, h_taps):
    # x1_ref : (1, Hi*C1, Wi)       deeper feature map, (hi, c) sublane-major
    # x2_ref : (1, C1, H*W)         skip connection (NCHW, spatial flattened)
    # uw_ref : (Wi, W)              separable W-direction upsample+pad operator
    # mask_ref: (2, H*W)            0/1 masks for horizontal-wrap columns
    # w*_ref : (9, Cout_like, Cin)  per-tap conv weights, BN scale folded in
    # b*_ref : (Cout_like, 1)       folded BatchNorm bias (f32)
    # o_ref  : (1, Cout, H*W)       lane-dense output block
    # pad*f  : VMEM scratch (C, (H+2)*W + 2), row-flattened padded activations
    # h_taps : per output row, tuple of (src_row, weight) pairs (static)
    HW = H * W
    cdt = pad1f.dtype
    C1 = x2_ref.shape[1]
    cin = pad1f.shape[0]
    cmid = pad2f.shape[0]

    m_not_first = mask_ref[0:1, :]            # zero where w == 0
    m_not_last = mask_ref[1:2, :]             # zero where w == W-1

    # --- 0. zero ONLY the halo (front/back guards + padded top/bottom rows).
    #        The interior [W+1, W+1+HW) is fully overwritten every grid step,
    #        so this is megacore-safe and avoids the full-scratch store sweep.
    pad1f[:, 0:W + 1] = jnp.zeros((cin, W + 1), cdt)
    pad1f[:, W + 1 + HW:] = jnp.zeros((cin, W + 1), cdt)
    pad2f[:, 0:W + 1] = jnp.zeros((cmid, W + 1), cdt)
    pad2f[:, W + 1 + HW:] = jnp.zeros((cmid, W + 1), cdt)

    # --- 1. stage the skip connection (first half of the implicit channel concat)
    pad1f[0:C1, W + 1:W + 1 + HW] = x2_ref[0].astype(cdt)

    # --- 2. separable bilinear x2 upsample + F.pad of x1 (second half of concat)
    #        W pass: one MXU matmul.  H pass: per output row a <=2-tap weighted
    #        combine of input rows (host-baked Python-constant weights), staged
    #        directly into its final location in the conv-1 buffer.
    tw = jnp.dot(x1_ref[0].astype(cdt), uw_ref[...],
                 preferred_element_type=jnp.float32)           # (Hi*C1, W) f32
    zero_row = jnp.zeros((C1, W), cdt)
    for h, taps in enumerate(h_taps):
        dst = pl.ds(W + 1 + h * W, W)
        if taps:
            row = None
            for src, wgt in taps:
                part = wgt * tw[src * C1:(src + 1) * C1, :]
                row = part if row is None else row + part
            pad1f[C1:cin, dst] = row.astype(cdt)
        else:                                   # fully inside the F.pad region
            pad1f[C1:cin, dst] = zero_row

    # --- 3. conv3x3 as nine per-tap matmuls accumulated in f32 (no im2col
    #        materialization).  BN scale already folded into the weights, so the
    #        epilogue is bias-add + ReLU.  Note: for very small Cin a fused
    #        K=9*Cin matmul would fill the MXU better; per-tap is the form that
    #        scales to production channel counts without a 9x activation buffer.
    def conv_bn_relu(pref, w_ref, b_ref):
        acc = None
        for t in range(9):
            ky, kx = divmod(t, 3)
            s = ky * W + kx
            tap = pref[:, s:s + HW]             # contiguous lane slice
            if kx == 0:                         # wrap from previous row's last col
                tap = tap * m_not_first
            elif kx == 2:                       # wrap into next row's first col
                tap = tap * m_not_last
            part = jnp.dot(w_ref[t], tap, preferred_element_type=jnp.float32)
            acc = part if acc is None else acc + part
        return jnp.maximum(acc + b_ref[...], 0.0)

    y1 = conv_bn_relu(pad1f, w1_ref, b1_ref)                   # (Cmid, HW) f32
    pad2f[:, W + 1:W + 1 + HW] = y1.astype(cdt)                # mid tensor stays in VMEM
    y2 = conv_bn_relu(pad2f, w2_ref, b2_ref)                   # (Cout, HW) f32
    o_ref[0] = y2.astype(o_ref.dtype)                          # lane-dense store


# ---------------------------------------------------------------------------
# The Up module (bilinear=True)
# ---------------------------------------------------------------------------
class UpPallas:
    def __init__(self, in_channels, out_channels, key, compute_dtype=jnp.bfloat16):
        assert in_channels % 2 == 0
        self.in_channels = in_channels
        self.mid_channels = in_channels // 2
        self.out_channels = out_channels
        self.compute_dtype = compute_dtype

        k1, k2 = jax.random.split(key, 2)
        self.w1 = 0.1 * jax.random.normal(
            k1, (3, 3, in_channels, self.mid_channels), jnp.float32)   # HWIO
        self.w2 = 0.1 * jax.random.normal(
            k2, (3, 3, self.mid_channels, out_channels), jnp.float32)

        # deterministic eval-mode BatchNorm params folded into scale/bias
        eps = 1e-5

        def fold(c):
            gamma = 1.0 + 0.10 * jnp.arange(c, dtype=jnp.float32)
            beta = 0.05 * jnp.arange(c, dtype=jnp.float32)
            mean = 0.01 * jnp.arange(c, dtype=jnp.float32)
            var = 1.0 + 0.02 * jnp.arange(c, dtype=jnp.float32)
            scale = gamma / jnp.sqrt(var + eps)
            return scale, beta - mean * scale

        self.scale1, self.bias1 = fold(self.mid_channels)
        self.scale2, self.bias2 = fold(out_channels)

        # host-side one-time packing:
        #   weights HWIO -> (9, Cout_like, Cin) per-tap matrices with the BN scale
        #   folded in (Cin order = [x2 channels, x1 channels], matching
        #   torch.cat([x2, x1])); biases pre-shaped (C, 1), kept in f32.
        cin, cmid, cout = in_channels, self.mid_channels, out_channels
        self._w1 = (jnp.transpose(self.w1, (0, 1, 3, 2)).reshape(9, cmid, cin)
                    * self.scale1[None, :, None]).astype(compute_dtype)
        self._w2 = (jnp.transpose(self.w2, (0, 1, 3, 2)).reshape(9, cout, cmid)
                    * self.scale2[None, :, None]).astype(compute_dtype)
        self._b1 = self.bias1.reshape(cmid, 1)
        self._b2 = self.bias2.reshape(cout, 1)

    def __call__(self, x1, x2):
        # x1: (N, C1, Hi, Wi) deeper map; x2: (N, C1, H, W) skip connection (NCHW).
        N, C1, Hi, Wi = x1.shape
        N2, C1b, H, W = x2.shape
        assert N2 == N and C1b == C1 and 2 * C1 == self.in_channels
        cin, cmid, cout = self.in_channels, self.mid_channels, self.out_channels
        cdt = self.compute_dtype

        # separable upsample (+ F.pad centering / cropping) operators
        uw = jnp.asarray(
            _interp_pad_matrix(W, 2 * Wi, Wi, (W - 2 * Wi) // 2).T, dtype=cdt)  # (Wi, W)
        uh_np = _interp_pad_matrix(H, 2 * Hi, Hi, (H - 2 * Hi) // 2)            # (H, Hi)
        h_taps = tuple(
            tuple((int(i), float(uh_np[h, i])) for i in range(Hi) if uh_np[h, i] != 0.0)
            for h in range(H))

        # 0/1 masks fixing the horizontal wrap of the row-flattened conv slices
        col = np.arange(H * W, dtype=np.int64) % W
        masks = jnp.asarray(
            np.stack([(col != 0), (col != W - 1)]).astype(np.float32), dtype=cdt)

        # x1: NCHW -> (N, Hi, C1, Wi) -> (N, Hi*C1, Wi)  (tiny transpose of the
        # smallest tensor so the in-kernel H pass uses contiguous sublane slices);
        # x2: free trailing-dim flatten.
        x1t = jnp.transpose(x1, (0, 2, 1, 3)).reshape(N, Hi * C1, Wi)
        x2f = x2.reshape(N, C1, H * W)

        invariant = pl.BlockSpec(memory_space=pltpu.MemorySpace.VMEM)

        kernel = functools.partial(_up_fused_kernel, H=H, W=W, h_taps=h_taps)
        out = pl.pallas_call(
            kernel,
            out_shape=jax.ShapeDtypeStruct((N, cout, H * W), x2.dtype),
            grid_spec=pltpu.PrefetchScalarGridSpec(
                num_scalar_prefetch=0,
                grid=(N,),
                in_specs=[
                    pl.BlockSpec((1, Hi * C1, Wi), lambda n: (n, 0, 0)),
                    pl.BlockSpec((1, C1, H * W), lambda n: (n, 0, 0)),
                    # grid-invariant operands: whole-array, single VMEM buffer
                    invariant,   # uw
                    invariant,   # masks
                    invariant,   # w1 (per-tap, BN-scale folded)
                    invariant,   # b1
                    invariant,   # w2
                    invariant,   # b2
                ],
                out_specs=pl.BlockSpec((1, cout, H * W), lambda n: (n, 0, 0)),
                scratch_shapes=[
                    pltpu.VMEM((cin, (H + 2) * W + 2), cdt),
                    pltpu.VMEM((cmid, (H + 2) * W + 2), cdt),
                ],
            ),
            compiler_params=pltpu.CompilerParams(
                dimension_semantics=("parallel",),
                # sized for v7x's 64 MiB VMEM (half of v5e/v6e); see row-tile TODO
                vmem_limit_bytes=32 * 1024 * 1024,
            ),
        )(x1t, x2f, uw, masks, self._w1, self._b1, self._w2, self._b2)
        return out.reshape(N, cout, H, W)


# ---------------------------------------------------------------------------
# Pure-JAX reference for verification (independent path: einsum + pad + XLA conv)
# ---------------------------------------------------------------------------
def _reference(up, x1, x2):
    Hi, Wi = x1.shape[2], x1.shape[3]
    uh = jnp.asarray(_interp_matrix(2 * Hi, Hi))
    uw = jnp.asarray(_interp_matrix(2 * Wi, Wi))
    x1u = jnp.einsum('oh,nchw->ncow', uh, x1)
    x1u = jnp.einsum('pw,ncow->ncop', uw, x1u)
    dY = x2.shape[2] - x1u.shape[2]
    dX = x2.shape[3] - x1u.shape[3]
    x1u = jnp.pad(x1u, ((0, 0), (0, 0),
                        (dY // 2, dY - dY // 2),
                        (dX // 2, dX - dX // 2)))
    x = jnp.concatenate([x2, x1u], axis=1)

    def conv(z, w, s, b):
        y = jax.lax.conv_general_dilated(
            z, w, (1, 1), 'SAME',
            dimension_numbers=('NCHW', 'HWIO', 'NCHW'))
        return jnp.maximum(y * s[None, :, None, None] + b[None, :, None, None], 0.0)

    y = conv(x, up.w1, up.scale1, up.bias1)
    y = conv(y, up.w2, up.scale2, up.bias2)
    return y


if __name__ == "__main__":
    key = jax.random.PRNGKey(0)
    k_p, k_x1, k_x2 = jax.random.split(key, 3)

    in_channels, out_channels = 8, 4          # concat channels = 8, mid = 4
    N, H, W = 2, 16, 16
    # x1 is the deeper feature map (in_channels//2 channels, half spatial size)
    x1 = jax.random.normal(k_x1, (N, in_channels // 2, H // 2, W // 2), jnp.float32)
    x2 = jax.random.normal(k_x2, (N, in_channels // 2, H, W), jnp.float32)

    # f32 compute path (tight check)
    up_f32 = UpPallas(in_channels, out_channels, k_p, compute_dtype=jnp.float32)
    out = jax.block_until_ready(up_f32(x1, x2))
    ref = jax.block_until_ready(_reference(up_f32, x1, x2))
    np.testing.assert_allclose(np.asarray(out), np.asarray(ref), rtol=1e-4, atol=1e-4)
    assert out.shape == (N, out_channels, H, W)

    # default path: bf16 MXU operands + bf16 staging scratch, f32 accumulation
    # and f32 bias/ReLU epilogue (loose check)
    up_bf16 = UpPallas(in_channels, out_channels, k_p)
    out_bf16 = jax.block_until_ready(up_bf16(x1, x2))
    np.testing.assert_allclose(np.asarray(out_bf16), np.asarray(ref), rtol=1e-1, atol=1e-1)

    print("KERNEL_OK")
</pallas_src>

<mosaic_0001>
module attributes {stable_mosaic.version = 11 : i64} {
  func.func @_up_fused_kernel(%arg0: i32, %arg1: memref<1x32x8xf32, #tpu.memory_space<vmem>>, %arg2: memref<1x4x256xf32, #tpu.memory_space<vmem>>, %arg3: memref<8x16xf32, #tpu.memory_space<vmem>>, %arg4: memref<2x256xf32, #tpu.memory_space<vmem>>, %arg5: memref<9x4x8xf32, #tpu.memory_space<vmem>>, %arg6: memref<4x1xf32, #tpu.memory_space<vmem>>, %arg7: memref<9x4x4xf32, #tpu.memory_space<vmem>>, %arg8: memref<4x1xf32, #tpu.memory_space<vmem>>, %arg9: memref<1x4x256xf32, #tpu.memory_space<vmem>>, %arg10: memref<8x290xf32, #tpu.memory_space<vmem>>, %arg11: memref<4x290xf32, #tpu.memory_space<vmem>>) attributes {dimension_semantics = [#tpu.dimension_semantics<parallel>], iteration_bounds = array<i64: 2>, scalar_prefetch = 0 : i64, scratch_operands = 2 : i64, tpu.core_type = #tpu.core_type<tc>, window_params = [{transform_indices = @transform_0, window_bounds = array<i64: 1, 32, 8>}, {transform_indices = @transform_1, window_bounds = array<i64: 1, 4, 256>}, {pipeline_mode = #tpu.pipeline_mode<synchronous>, transform_indices = @transform_2, window_bounds = array<i64: 8, 16>}, {pipeline_mode = #tpu.pipeline_mode<synchronous>, transform_indices = @transform_3, window_bounds = array<i64: 2, 256>}, {pipeline_mode = #tpu.pipeline_mode<synchronous>, transform_indices = @transform_4, window_bounds = array<i64: 9, 4, 8>}, {pipeline_mode = #tpu.pipeline_mode<synchronous>, transform_indices = @transform_5, window_bounds = array<i64: 4, 1>}, {pipeline_mode = #tpu.pipeline_mode<synchronous>, transform_indices = @transform_6, window_bounds = array<i64: 9, 4, 4>}, {pipeline_mode = #tpu.pipeline_mode<synchronous>, transform_indices = @transform_7, window_bounds = array<i64: 4, 1>}, {transform_indices = @transform_8, window_bounds = array<i64: 1, 4, 256>}]} {
    %c0 = arith.constant 0 : index
    %c0_0 = arith.constant 0 : index
    %0 = vector.load %arg4[%c0, %c0_0] : memref<2x256xf32, #tpu.memory_space<vmem>>, vector<1x256xf32>
    %c1 = arith.constant 1 : index
    %c0_1 = arith.constant 0 : index
    %1 = vector.load %arg4[%c1, %c0_1] : memref<2x256xf32, #tpu.memory_space<vmem>>, vector<1x256xf32>
    %cst = arith.constant 0.000000e+00 : f32
    %2 = vector.broadcast %cst : f32 to vector<8x17xf32>
    %c0_2 = arith.constant 0 : index
    %c0_3 = arith.constant 0 : index
    %3 = vector.load %arg10[%c0_2, %c0_3] : memref<8x290xf32, #tpu.memory_space<vmem>>, vector<8x17xf32>
    tpu.vector_store %arg10[%c0_2, %c0_3], %2 {strides = array<i32>} : memref<8x290xf32, #tpu.memory_space<vmem>>, vector<8x17xf32>,
    %cst_4 = arith.constant 0.000000e+00 : f32
    %4 = vector.broadcast %cst_4 : f32 to vector<8x17xf32>
    %c0_5 = arith.constant 0 : index
    %c273 = arith.constant 273 : index
    %5 = vector.load %arg10[%c0_5, %c273] : memref<8x290xf32, #tpu.memory_space<vmem>>, vector<8x17xf32>
    tpu.vector_store %arg10[%c0_5, %c273], %4 {strides = array<i32>} : memref<8x290xf32, #tpu.memory_space<vmem>>, vector<8x17xf32>,
    %cst_6 = arith.constant 0.000000e+00 : f32
    %6 = vector.broadcast %cst_6 : f32 to vector<4x17xf32>
    %c0_7 = arith.constant 0 : index
    %c0_8 = arith.constant 0 : index
    %7 = vector.load %arg11[%c0_7, %c0_8] : memref<4x290xf32, #tpu.memory_space<vmem>>, vector<4x17xf32>
    tpu.vector_store %arg11[%c0_7, %c0_8], %6 {strides = array<i32>} : memref<4x290xf32, #tpu.memory_space<vmem>>, vector<4x17xf32>,
    %cst_9 = arith.constant 0.000000e+00 : f32
    %8 = vector.broadcast %cst_9 : f32 to vector<4x17xf32>
    %c0_10 = arith.constant 0 : index
    %c273_11 = arith.constant 273 : index
    %9 = vector.load %arg11[%c0_10, %c273_11] : memref<4x290xf32, #tpu.memory_space<vmem>>, vector<4x17xf32>
    tpu.vector_store %arg11[%c0_10, %c273_11], %8 {strides = array<i32>} : memref<4x290xf32, #tpu.memory_space<vmem>>, vector<4x17xf32>,
    %c0_12 = arith.constant 0 : index
    %c0_13 = arith.constant 0 : index
    %c0_14 = arith.constant 0 : index
    %10 = vector.load %arg2[%c0_12, %c0_13, %c0_14] : memref<1x4x256xf32, #tpu.memory_space<vmem>>, vector<1x4x256xf32>
    %11 = vector.shape_cast %10 : vector<1x4x256xf32> to vector<4x256xf32>
    %c0_15 = arith.constant 0 : index
    %c17 = arith.constant 17 : index
    %12 = vector.load %arg10[%c0_15, %c17] : memref<8x290xf32, #tpu.memory_space<vmem>>, vector<4x256xf32>
    tpu.vector_store %arg10[%c0_15, %c17], %11 {strides = array<i32>} : memref<8x290xf32, #tpu.memory_space<vmem>>, vector<4x256xf32>,
    %c0_16 = arith.constant 0 : index
    %c0_17 = arith.constant 0 : index
    %c0_18 = arith.constant 0 : index
    %13 = vector.load %arg1[%c0_16, %c0_17, %c0_18] : memref<1x32x8xf32, #tpu.memory_space<vmem>>, vector<1x32x8xf32>
    %14 = vector.shape_cast %13 : vector<1x32x8xf32> to vector<32x8xf32>
    %c0_19 = arith.constant 0 : index
    %c0_20 = arith.constant 0 : index
    %15 = vector.load %arg3[%c0_19, %c0_20] : memref<8x16xf32, #tpu.memory_space<vmem>>, vector<8x16xf32>
    %cst_21 = arith.constant dense<0.000000e+00> : vector<32x16xf32>
    %16 = tpu.matmul %14, %15, %cst_21 {dimension_numbers = #tpu.dot_dimension_numbers<[1], [0], [0], [1], [0, 0, 1, 1], [], []>} : vector<32x8xf32>, vector<8x16xf32>, vector<32x16xf32> -> vector<32x16xf32>
    %17 = vector.extract_strided_slice %16 {offsets = [0, 0], sizes = [4, 16], strides = [1, 1]} : vector<32x16xf32> to vector<4x16xf32>
    %cst_22 = arith.constant 1.000000e+00 : f32
    %18 = vector.broadcast %cst_22 : f32 to vector<4x16xf32>
    %19 = arith.mulf %18, %17 : vector<4x16xf32>
    %c4 = arith.constant 4 : index
    %c17_23 = arith.constant 17 : index
    %20 = vector.load %arg10[%c4, %c17_23] : memref<8x290xf32, #tpu.memory_space<vmem>>, vector<4x16xf32>
    tpu.vector_store %arg10[%c4, %c17_23], %19 {strides = array<i32>} : memref<8x290xf32, #tpu.memory_space<vmem>>, vector<4x16xf32>,
    %21 = vector.extract_strided_slice %16 {offsets = [0, 0], sizes = [4, 16], strides = [1, 1]} : vector<32x16xf32> to vector<4x16xf32>
    %cst_24 = arith.constant 0.533333361 : f32
    %22 = vector.broadcast %cst_24 : f32 to vector<4x16xf32>
    %23 = arith.mulf %22, %21 : vector<4x16xf32>
    %24 = vector.extract_strided_slice %16 {offsets = [4, 0], sizes = [4, 16], strides = [1, 1]} : vector<32x16xf32> to vector<4x16xf32>
    %cst_25 = arith.constant 0.466666669 : f32
    %25 = vector.broadcast %cst_25 : f32 to vector<4x16xf32>
    %26 = arith.mulf %25, %24 : vector<4x16xf32>
    %27 = arith.addf %23, %26 : vector<4x16xf32>
    %c4_26 = arith.constant 4 : index
    %c33 = arith.constant 33 : index
    %28 = vector.load %arg10[%c4_26, %c33] : memref<8x290xf32, #tpu.memory_space<vmem>>, vector<4x16xf32>
    tpu.vector_store %arg10[%c4_26, %c33], %27 {strides = array<i32>} : memref<8x290xf32, #tpu.memory_space<vmem>>, vector<4x16xf32>,
    %29 = vector.extract_strided_slice %16 {offsets = [0, 0], sizes = [4, 16], strides = [1, 1]} : vector<32x16xf32> to vector<4x16xf32>
    %cst_27 = arith.constant 0.0666666701 : f32
    %30 = vector.broadcast %cst_27 : f32 to vector<4x16xf32>
    %31 = arith.mulf %30, %29 : vector<4x16xf32>
    %32 = vector.extract_strided_slice %16 {offsets = [4, 0], sizes = [4, 16], strides = [1, 1]} : vector<32x16xf32> to vector<4x16xf32>
    %cst_28 = arith.constant 0.933333337 : f32
    %33 = vector.broadcast %cst_28 : f32 to vector<4x16xf32>
    %34 = arith.mulf %33, %32 : vector<4x16xf32>
    %35 = arith.addf %31, %34 : vector<4x16xf32>
    %c4_29 = arith.constant 4 : index
    %c49 = arith.constant 49 : index
    %36 = vector.load %arg10[%c4_29, %c49] : memref<8x290xf32, #tpu.memory_space<vmem>>, vector<4x16xf32>
    tpu.vector_store %arg10[%c4_29, %c49], %35 {strides = array<i32>} : memref<8x290xf32, #tpu.memory_space<vmem>>, vector<4x16xf32>,
    %37 = vector.extract_strided_slice %16 {offsets = [4, 0], sizes = [4, 16], strides = [1, 1]} : vector<32x16xf32> to vector<4x16xf32>
    %cst_30 = arith.constant 6.000000e-01 : f32
    %38 = vector.broadcast %cst_30 : f32 to vector<4x16xf32>
    %39 = arith.mulf %38, %37 : vector<4x16xf32>
    %40 = vector.extract_strided_slice %16 {offsets = [8, 0], sizes = [4, 16], strides = [1, 1]} : vector<32x16xf32> to vector<4x16xf32>
    %cst_31 = arith.constant 4.000000e-01 : f32
    %41 = vector.broadcast %cst_31 : f32 to vector<4x16xf32>
    %42 = arith.mulf %41, %40 : vector<4x16xf32>
    %43 = arith.addf %39, %42 : vector<4x16xf32>
    %c4_32 = arith.constant 4 : index
    %c65 = arith.constant 65 : index
    %44 = vector.load %arg10[%c4_32, %c65] : memref<8x290xf32, #tpu.memory_space<vmem>>, vector<4x16xf32>
    tpu.vector_store %arg10[%c4_32, %c65], %43 {strides = array<i32>} : memref<8x290xf32, #tpu.memory_space<vmem>>, vector<4x16xf32>,
    %45 = vector.extract_strided_slice %16 {offsets = [4, 0], sizes = [4, 16], strides = [1, 1]} : vector<32x16xf32> to vector<4x16xf32>
    %cst_33 = arith.constant 0.13333334 : f32
    %46 = vector.broadcast %cst_33 : f32 to vector<4x16xf32>
    %47 = arith.mulf %46, %45 : vector<4x16xf32>
    %48 = vector.extract_strided_slice %16 {offsets = [8, 0], sizes = [4, 16], strides = [1, 1]} : vector<32x16xf32> to vector<4x16xf32>
    %cst_34 = arith.constant 0.866666674 : f32
    %49 = vector.broadcast %cst_34 : f32 to vector<4x16xf32>
    %50 = arith.mulf %49, %48 : vector<4x16xf32>
    %51 = arith.addf %47, %50 : vector<4x16xf32>
    %c4_35 = arith.constant 4 : index
    %c81 = arith.constant 81 : index
    %52 = vector.load %arg10[%c4_35, %c81] : memref<8x290xf32, #tpu.memory_space<vmem>>, vector<4x16xf32>
    tpu.vector_store %arg10[%c4_35, %c81], %51 {strides = array<i32>} : memref<8x290xf32, #tpu.memory_space<vmem>>, vector<4x16xf32>,
    %53 = vector.extract_strided_slice %16 {offsets = [8, 0], sizes = [4, 16], strides = [1, 1]} : vector<32x16xf32> to vector<4x16xf32>
    %cst_36 = arith.constant 0.666666686 : f32
    %54 = vector.broadcast %cst_36 : f32 to vector<4x16xf32>
    %55 = arith.mulf %54, %53 : vector<4x16xf32>
    %56 = vector.extract_strided_slice %16 {offsets = [12, 0], sizes = [4, 16], strides = [1, 1]} : vector<32x16xf32> to vector<4x16xf32>
    %cst_37 = arith.constant 0.333333343 : f32
    %57 = vector.broadcast %cst_37 : f32 to vector<4x16xf32>
    %58 = arith.mulf %57, %56 : vector<4x16xf32>
    %59 = arith.addf %55, %58 : vector<4x16xf32>
    %c4_38 = arith.constant 4 : index
    %c97 = arith.constant 97 : index
    %60 = vector.load %arg10[%c4_38, %c97] : memref<8x290xf32, #tpu.memory_space<vmem>>, vector<4x16xf32>
    tpu.vector_store %arg10[%c4_38, %c97], %59 {strides = array<i32>} : memref<8x290xf32, #tpu.memory_space<vmem>>, vector<4x16xf32>,
    %61 = vector.extract_strided_slice %16 {offsets = [8, 0], sizes = [4, 16], strides = [1, 1]} : vector<32x16xf32> to vector<4x16xf32>
    %cst_39 = arith.constant 2.000000e-01 : f32
    %62 = vector.broadcast %cst_39 : f32 to vector<4x16xf32>
    %63 = arith.mulf %62, %61 : vector<4x16xf32>
    %64 = vector.extract_strided_slice %16 {offsets = [12, 0], sizes = [4, 16], strides = [1, 1]} : vector<32x16xf32> to vector<4x16xf32>
    %cst_40 = arith.constant 8.000000e-01 : f32
    %65 = vector.broadcast %cst_40 : f32 to vector<4x16xf32>
    %66 = arith.mulf %65, %64 : vector<4x16xf32>
    %67 = arith.addf %63, %66 : vector<4x16xf32>
    %c4_41 = arith.constant 4 : index
    %c113 = arith.constant 113 : index
    %68 = vector.load %arg10[%c4_41, %c113] : memref<8x290xf32, #tpu.memory_space<vmem>>, vector<4x16xf32>
    tpu.vector_store %arg10[%c4_41, %c113], %67 {strides = array<i32>} : memref<8x290xf32, #tpu.memory_space<vmem>>, vector<4x16xf32>,
    %69 = vector.extract_strided_slice %16 {offsets = [12, 0], sizes = [4, 16], strides = [1, 1]} : vector<32x16xf32> to vector<4x16xf32>
    %cst_42 = arith.constant 0.733333349 : f32
    %70 = vector.broadcast %cst_42 : f32 to vector<4x16xf32>
    %71 = arith.mulf %70, %69 : vector<4x16xf32>
    %72 = vector.extract_strided_slice %16 {offsets = [16, 0], sizes = [4, 16], strides = [1, 1]} : vector<32x16xf32> to vector<4x16xf32>
    %cst_43 = arith.constant 0.266666681 : f32
    %73 = vector.broadcast %cst_43 : f32 to vector<4x16xf32>
    %74 = arith.mulf %73, %72 : vector<4x16xf32>
    %75 = arith.addf %71, %74 : vector<4x16xf32>
    %c4_44 = arith.constant 4 : index
    %c129 = arith.constant 129 : index
    %76 = vector.load %arg10[%c4_44, %c129] : memref<8x290xf32, #tpu.memory_space<vmem>>, vector<4x16xf32>
    tpu.vector_store %arg10[%c4_44, %c129], %75 {strides = array<i32>} : memref<8x290xf32, #tpu.memory_space<vmem>>, vector<4x16xf32>,
    %77 = vector.extract_strided_slice %16 {offsets = [12, 0], sizes = [4, 16], strides = [1, 1]} : vector<32x16xf32> to vector<4x16xf32>
    %cst_45 = arith.constant 0.266666681 : f32
    %78 = vector.broadcast %cst_45 : f32 to vector<4x16xf32>
    %79 = arith.mulf %78, %77 : vector<4x16xf32>
    %80 = vector.extract_strided_slice %16 {offsets = [16, 0], sizes = [4, 16], strides = [1, 1]} : vector<32x16xf32> to vector<4x16xf32>
    %cst_46 = arith.constant 0.733333349 : f32
    %81 = vector.broadcast %cst_46 : f32 to vector<4x16xf32>
    %82 = arith.mulf %81, %80 : vector<4x16xf32>
    %83 = arith.addf %79, %82 : vector<4x16xf32>
    %c4_47 = arith.constant 4 : index
    %c145 = arith.constant 145 : index
    %84 = vector.load %arg10[%c4_47, %c145] : memref<8x290xf32, #tpu.memory_space<vmem>>, vector<4x16xf32>
    tpu.vector_store %arg10[%c4_47, %c145], %83 {strides = array<i32>} : memref<8x290xf32, #tpu.memory_space<vmem>>, vector<4x16xf32>,
    %85 = vector.extract_strided_slice %16 {offsets = [16, 0], sizes = [4, 16], strides = [1, 1]} : vector<32x16xf32> to vector<4x16xf32>
    %cst_48 = arith.constant 8.000000e-01 : f32
    %86 = vector.broadcast %cst_48 : f32 to vector<4x16xf32>
    %87 = arith.mulf %86, %85 : vector<4x16xf32>
    %88 = vector.extract_strided_slice %16 {offsets = [20, 0], sizes = [4, 16], strides = [1, 1]} : vector<32x16xf32> to vector<4x16xf32>
    %cst_49 = arith.constant 2.000000e-01 : f32
    %89 = vector.broadcast %cst_49 : f32 to vector<4x16xf32>
    %90 = arith.mulf %89, %88 : vector<4x16xf32>
    %91 = arith.addf %87, %90 : vector<4x16xf32>
    %c4_50 = arith.constant 4 : index
    %c161 = arith.constant 161 : index
    %92 = vector.load %arg10[%c4_50, %c161] : memref<8x290xf32, #tpu.memory_space<vmem>>, vector<4x16xf32>
    tpu.vector_store %arg10[%c4_50, %c161], %91 {strides = array<i32>} : memref<8x290xf32, #tpu.memory_space<vmem>>, vector<4x16xf32>,
    %93 = vector.extract_strided_slice %16 {offsets = [16, 0], sizes = [4, 16], strides = [1, 1]} : vector<32x16xf32> to vector<4x16xf32>
    %cst_51 = arith.constant 0.333333343 : f32
    %94 = vector.broadcast %cst_51 : f32 to vector<4x16xf32>
    %95 = arith.mulf %94, %93 : vector<4x16xf32>
    %96 = vector.extract_strided_slice %16 {offsets = [20, 0], sizes = [4, 16], strides = [1, 1]} : vector<32x16xf32> to vector<4x16xf32>
    %cst_52 = arith.constant 0.666666686 : f32
    %97 = vector.broadcast %cst_52 : f32 to vector<4x16xf32>
    %98 = arith.mulf %97, %96 : vector<4x16xf32>
    %99 = arith.addf %95, %98 : vector<4x16xf32>
    %c4_53 = arith.constant 4 : index
    %c177 = arith.constant 177 : index
    %100 = vector.load %arg10[%c4_53, %c177] : memref<8x290xf32, #tpu.memory_space<vmem>>, vector<4x16xf32>
    tpu.vector_store %arg10[%c4_53, %c177], %99 {strides = array<i32>} : memref<8x290xf32, #tpu.memory_space<vmem>>, vector<4x16xf32>,
    %101 = vector.extract_strided_slice %16 {offsets = [20, 0], sizes = [4, 16], strides = [1, 1]} : vector<32x16xf32> to vector<4x16xf32>
    %cst_54 = arith.constant 0.866666674 : f32
    %102 = vector.broadcast %cst_54 : f32 to vector<4x16xf32>
    %103 = arith.mulf %102, %101 : vector<4x16xf32>
    %104 = vector.extract_strided_slice %16 {offsets = [24, 0], sizes = [4, 16], strides = [1, 1]} : vector<32x16xf32> to vector<4x16xf32>
    %cst_55 = arith.constant 0.13333334 : f32
    %105 = vector.broadcast %cst_55 : f32 to vector<4x16xf32>
    %106 = arith.mulf %105, %104 : vector<4x16xf32>
    %107 = arith.addf %103, %106 : vector<4x16xf32>
    %c4_56 = arith.constant 4 : index
    %c193 = arith.constant 193 : index
    %108 = vector.load %arg10[%c4_56, %c193] : memref<8x290xf32, #tpu.memory_space<vmem>>, vector<4x16xf32>
    tpu.vector_store %arg10[%c4_56, %c193], %107 {strides = array<i32>} : memref<8x290xf32, #tpu.memory_space<vmem>>, vector<4x16xf32>,
    %109 = vector.extract_strided_slice %16 {offsets = [20, 0], sizes = [4, 16], strides = [1, 1]} : vector<32x16xf32> to vector<4x16xf32>
    %cst_57 = arith.constant 4.000000e-01 : f32
    %110 = vector.broadcast %cst_57 : f32 to vector<4x16xf32>
    %111 = arith.mulf %110, %109 : vector<4x16xf32>
    %112 = vector.extract_strided_slice %16 {offsets = [24, 0], sizes = [4, 16], strides = [1, 1]} : vector<32x16xf32> to vector<4x16xf32>
    %cst_58 = arith.constant 6.000000e-01 : f32
    %113 = vector.broadcast %cst_58 : f32 to vector<4x16xf32>
    %114 = arith.mulf %113, %112 : vector<4x16xf32>
    %115 = arith.addf %111, %114 : vector<4x16xf32>
    %c4_59 = arith.constant 4 : index
    %c209 = arith.constant 209 : index
    %116 = vector.load %arg10[%c4_59, %c209] : memref<8x290xf32, #tpu.memory_space<vmem>>, vector<4x16xf32>
    tpu.vector_store %arg10[%c4_59, %c209], %115 {strides = array<i32>} : memref<8x290xf32, #tpu.memory_space<vmem>>, vector<4x16xf32>,
    %117 = vector.extract_strided_slice %16 {offsets = [24, 0], sizes = [4, 16], strides = [1, 1]} : vector<32x16xf32> to vector<4x16xf32>
    %cst_60 = arith.constant 0.933333337 : f32
    %118 = vector.broadcast %cst_60 : f32 to vector<4x16xf32>
    %119 = arith.mulf %118, %117 : vector<4x16xf32>
    %120 = vector.extract_strided_slice %16 {offsets = [28, 0], sizes = [4, 16], strides = [1, 1]} : vector<32x16xf32> to vector<4x16xf32>
    %cst_61 = arith.constant 0.0666666701 : f32
    %121 = vector.broadcast %cst_61 : f32 to vector<4x16xf32>
    %122 = arith.mulf %121, %120 : vector<4x16xf32>
    %123 = arith.addf %119, %122 : vector<4x16xf32>
    %c4_62 = arith.constant 4 : index
    %c225 = arith.constant 225 : index
    %124 = vector.load %arg10[%c4_62, %c225] : memref<8x290xf32, #tpu.memory_space<vmem>>, vector<4x16xf32>
    tpu.vector_store %arg10[%c4_62, %c225], %123 {strides = array<i32>} : memref<8x290xf32, #tpu.memory_space<vmem>>, vector<4x16xf32>,
    %125 = vector.extract_strided_slice %16 {offsets = [24, 0], sizes = [4, 16], strides = [1, 1]} : vector<32x16xf32> to vector<4x16xf32>
    %cst_63 = arith.constant 0.466666669 : f32
    %126 = vector.broadcast %cst_63 : f32 to vector<4x16xf32>
    %127 = arith.mulf %126, %125 : vector<4x16xf32>
    %128 = vector.extract_strided_slice %16 {offsets = [28, 0], sizes = [4, 16], strides = [1, 1]} : vector<32x16xf32> to vector<4x16xf32>
    %cst_64 = arith.constant 0.533333361 : f32
    %129 = vector.broadcast %cst_64 : f32 to vector<4x16xf32>
    %130 = arith.mulf %129, %128 : vector<4x16xf32>
    %131 = arith.addf %127, %130 : vector<4x16xf32>
    %c4_65 = arith.constant 4 : index
    %c241 = arith.constant 241 : index
    %132 = vector.load %arg10[%c4_65, %c241] : memref<8x290xf32, #tpu.memory_space<vmem>>, vector<4x16xf32>
    tpu.vector_store %arg10[%c4_65, %c241], %131 {strides = array<i32>} : memref<8x290xf32, #tpu.memory_space<vmem>>, vector<4x16xf32>,
    %133 = vector.extract_strided_slice %16 {offsets = [28, 0], sizes = [4, 16], strides = [1, 1]} : vector<32x16xf32> to vector<4x16xf32>
    %cst_66 = arith.constant 1.000000e+00 : f32
    %134 = vector.broadcast %cst_66 : f32 to vector<4x16xf32>
    %135 = arith.mulf %134, %133 : vector<4x16xf32>
    %c4_67 = arith.constant 4 : index
    %c257 = arith.constant 257 : index
    %136 = vector.load %arg10[%c4_67, %c257] : memref<8x290xf32, #tpu.memory_space<vmem>>, vector<4x16xf32>
    tpu.vector_store %arg10[%c4_67, %c257], %135 {strides = array<i32>} : memref<8x290xf32, #tpu.memory_space<vmem>>, vector<4x16xf32>,
    %c0_68 = arith.constant 0 : index
    %c0_69 = arith.constant 0 : index
    %137 = vector.load %arg10[%c0_68, %c0_69] : memref<8x290xf32, #tpu.memory_space<vmem>>, vector<8x256xf32>
    %138 = vector.broadcast %0 : vector<1x256xf32> to vector<8x256xf32>
    %139 = arith.mulf %137, %138 : vector<8x256xf32>
    %c0_70 = arith.constant 0 : index
    %c0_71 = arith.constant 0 : index
    %c0_72 = arith.constant 0 : index
    %140 = vector.load %arg5[%c0_70, %c0_71, %c0_72] : memref<9x4x8xf32, #tpu.memory_space<vmem>>, vector<1x4x8xf32>
    %141 = vector.shape_cast %140 : vector<1x4x8xf32> to vector<4x8xf32>
    %cst_73 = arith.constant dense<0.000000e+00> : vector<4x256xf32>
    %142 = tpu.matmul %141, %139, %cst_73 {dimension_numbers = #tpu.dot_dimension_numbers<[1], [0], [0], [1], [0, 0, 1, 1], [], []>} : vector<4x8xf32>, vector<8x256xf32>, vector<4x256xf32> -> vector<4x256xf32>
    %c0_74 = arith.constant 0 : index
    %c1_75 = arith.constant 1 : index
    %143 = vector.load %arg10[%c0_74, %c1_75] : memref<8x290xf32, #tpu.memory_space<vmem>>, vector<8x256xf32>
    %c1_76 = arith.constant 1 : index
    %c0_77 = arith.constant 0 : index
    %c0_78 = arith.constant 0 : index
    %144 = vector.load %arg5[%c1_76, %c0_77, %c0_78] : memref<9x4x8xf32, #tpu.memory_space<vmem>>, vector<1x4x8xf32>
    %145 = vector.shape_cast %144 : vector<1x4x8xf32> to vector<4x8xf32>
    %cst_79 = arith.constant dense<0.000000e+00> : vector<4x256xf32>
    %146 = tpu.matmul %145, %143, %cst_79 {dimension_numbers = #tpu.dot_dimension_numbers<[1], [0], [0], [1], [0, 0, 1, 1], [], []>} : vector<4x8xf32>, vector<8x256xf32>, vector<4x256xf32> -> vector<4x256xf32>
    %147 = arith.addf %142, %146 : vector<4x256xf32>
    %c0_80 = arith.constant 0 : index
    %c2 = arith.constant 2 : index
    %148 = vector.load %arg10[%c0_80, %c2] : memref<8x290xf32, #tpu.memory_space<vmem>>, vector<8x256xf32>
    %149 = vector.broadcast %1 : vector<1x256xf32> to vector<8x256xf32>
    %150 = arith.mulf %148, %149 : vector<8x256xf32>
    %c2_81 = arith.constant 2 : index
    %c0_82 = arith.constant 0 : index
    %c0_83 = arith.constant 0 : index
    %151 = vector.load %arg5[%c2_81, %c0_82, %c0_83] : memref<9x4x8xf32, #tpu.memory_space<vmem>>, vector<1x4x8xf32>
    %152 = vector.shape_cast %151 : vector<1x4x8xf32> to vector<4x8xf32>
    %cst_84 = arith.constant dense<0.000000e+00> : vector<4x256xf32>
    %153 = tpu.matmul %152, %150, %cst_84 {dimension_numbers = #tpu.dot_dimension_numbers<[1], [0], [0], [1], [0, 0, 1, 1], [], []>} : vector<4x8xf32>, vector<8x256xf32>, vector<4x256xf32> -> vector<4x256xf32>
    %154 = arith.addf %147, %153 : vector<4x256xf32>
    %c0_85 = arith.constant 0 : index
    %c16 = arith.constant 16 : index
    %155 = vector.load %arg10[%c0_85, %c16] : memref<8x290xf32, #tpu.memory_space<vmem>>, vector<8x256xf32>
    %156 = vector.broadcast %0 : vector<1x256xf32> to vector<8x256xf32>
    %157 = arith.mulf %155, %156 : vector<8x256xf32>
    %c3 = arith.constant 3 : index
    %c0_86 = arith.constant 0 : index
    %c0_87 = arith.constant 0 : index
    %158 = vector.load %arg5[%c3, %c0_86, %c0_87] : memref<9x4x8xf32, #tpu.memory_space<vmem>>, vector<1x4x8xf32>
    %159 = vector.shape_cast %158 : vector<1x4x8xf32> to vector<4x8xf32>
    %cst_88 = arith.constant dense<0.000000e+00> : vector<4x256xf32>
    %160 = tpu.matmul %159, %157, %cst_88 {dimension_numbers = #tpu.dot_dimension_numbers<[1], [0], [0], [1], [0, 0, 1, 1], [], []>} : vector<4x8xf32>, vector<8x256xf32>, vector<4x256xf32> -> vector<4x256xf32>
    %161 = arith.addf %154, %160 : vector<4x256xf32>
    %c0_89 = arith.constant 0 : index
    %c17_90 = arith.constant 17 : index
    %162 = vector.load %arg10[%c0_89, %c17_90] : memref<8x290xf32, #tpu.memory_space<vmem>>, vector<8x256xf32>
    %c4_91 = arith.constant 4 : index
    %c0_92 = arith.constant 0 : index
    %c0_93 = arith.constant 0 : index
    %163 = vector.load %arg5[%c4_91, %c0_92, %c0_93] : memref<9x4x8xf32, #tpu.memory_space<vmem>>, vector<1x4x8xf32>
    %164 = vector.shape_cast %163 : vector<1x4x8xf32> to vector<4x8xf32>
    %cst_94 = arith.constant dense<0.000000e+00> : vector<4x256xf32>
    %165 = tpu.matmul %164, %162, %cst_94 {dimension_numbers = #tpu.dot_dimension_numbers<[1], [0], [0], [1], [0, 0, 1, 1], [], []>} : vector<4x8xf32>, vector<8x256xf32>, vector<4x256xf32> -> vector<4x256xf32>
    %166 = arith.addf %161, %165 : vector<4x256xf32>
    %c0_95 = arith.constant 0 : index
    %c18 = arith.constant 18 : index
    %167 = vector.load %arg10[%c0_95, %c18] : memref<8x290xf32, #tpu.memory_space<vmem>>, vector<8x256xf32>
    %168 = vector.broadcast %1 : vector<1x256xf32> to vector<8x256xf32>
    %169 = arith.mulf %167, %168 : vector<8x256xf32>
    %c5 = arith.constant 5 : index
    %c0_96 = arith.constant 0 : index
    %c0_97 = arith.constant 0 : index
    %170 = vector.load %arg5[%c5, %c0_96, %c0_97] : memref<9x4x8xf32, #tpu.memory_space<vmem>>, vector<1x4x8xf32>
    %171 = vector.shape_cast %170 : vector<1x4x8xf32> to vector<4x8xf32>
    %cst_98 = arith.constant dense<0.000000e+00> : vector<4x256xf32>
    %172 = tpu.matmul %171, %169, %cst_98 {dimension_numbers = #tpu.dot_dimension_numbers<[1], [0], [0], [1], [0, 0, 1, 1], [], []>} : vector<4x8xf32>, vector<8x256xf32>, vector<4x256xf32> -> vector<4x256xf32>
    %173 = arith.addf %166, %172 : vector<4x256xf32>
    %c0_99 = arith.constant 0 : index
    %c32 = arith.constant 32 : index
    %174 = vector.load %arg10[%c0_99, %c32] : memref<8x290xf32, #tpu.memory_space<vmem>>, vector<8x256xf32>
    %175 = vector.broadcast %0 : vector<1x256xf32> to vector<8x256xf32>
    %176 = arith.mulf %174, %175 : vector<8x256xf32>
    %c6 = arith.constant 6 : index
    %c0_100 = arith.constant 0 : index
    %c0_101 = arith.constant 0 : index
    %177 = vector.load %arg5[%c6, %c0_100, %c0_101] : memref<9x4x8xf32, #tpu.memory_space<vmem>>, vector<1x4x8xf32>
    %178 = vector.shape_cast %177 : vector<1x4x8xf32> to vector<4x8xf32>
    %cst_102 = arith.constant dense<0.000000e+00> : vector<4x256xf32>
    %179 = tpu.matmul %178, %176, %cst_102 {dimension_numbers = #tpu.dot_dimension_numbers<[1], [0], [0], [1], [0, 0, 1, 1], [], []>} : vector<4x8xf32>, vector<8x256xf32>, vector<4x256xf32> -> vector<4x256xf32>
    %180 = arith.addf %173, %179 : vector<4x256xf32>
    %c0_103 = arith.constant 0 : index
    %c33_104 = arith.constant 33 : index
    %181 = vector.load %arg10[%c0_103, %c33_104] : memref<8x290xf32, #tpu.memory_space<vmem>>, vector<8x256xf32>
    %c7 = arith.constant 7 : index
    %c0_105 = arith.constant 0 : index
    %c0_106 = arith.constant 0 : index
    %182 = vector.load %arg5[%c7, %c0_105, %c0_106] : memref<9x4x8xf32, #tpu.memory_space<vmem>>, vector<1x4x8xf32>
    %183 = vector.shape_cast %182 : vector<1x4x8xf32> to vector<4x8xf32>
    %cst_107 = arith.constant dense<0.000000e+00> : vector<4x256xf32>
    %184 = tpu.matmul %183, %181, %cst_107 {dimension_numbers = #tpu.dot_dimension_numbers<[1], [0], [0], [1], [0, 0, 1, 1], [], []>} : vector<4x8xf32>, vector<8x256xf32>, vector<4x256xf32> -> vector<4x256xf32>
    %185 = arith.addf %180, %184 : vector<4x256xf32>
    %c0_108 = arith.constant 0 : index
    %c34 = arith.constant 34 : index
    %186 = vector.load %arg10[%c0_108, %c34] : memref<8x290xf32, #tpu.memory_space<vmem>>, vector<8x256xf32>
    %187 = vector.broadcast %1 : vector<1x256xf32> to vector<8x256xf32>
    %188 = arith.mulf %186, %187 : vector<8x256xf32>
    %c8 = arith.constant 8 : index
    %c0_109 = arith.constant 0 : index
    %c0_110 = arith.constant 0 : index
    %189 = vector.load %arg5[%c8, %c0_109, %c0_110] : memref<9x4x8xf32, #tpu.memory_space<vmem>>, vector<1x4x8xf32>
    %190 = vector.shape_cast %189 : vector<1x4x8xf32> to vector<4x8xf32>
    %cst_111 = arith.constant dense<0.000000e+00> : vector<4x256xf32>
    %191 = tpu.matmul %190, %188, %cst_111 {dimension_numbers = #tpu.dot_dimension_numbers<[1], [0], [0], [1], [0, 0, 1, 1], [], []>} : vector<4x8xf32>, vector<8x256xf32>, vector<4x256xf32> -> vector<4x256xf32>
    %192 = arith.addf %185, %191 : vector<4x256xf32>
    %c0_112 = arith.constant 0 : index
    %c0_113 = arith.constant 0 : index
    %193 = vector.load %arg6[%c0_112, %c0_113] : memref<4x1xf32, #tpu.memory_space<vmem>>, vector<4x1xf32>
    %194 = vector.broadcast %193 : vector<4x1xf32> to vector<4x256xf32>
    %195 = arith.addf %192, %194 : vector<4x256xf32>
    %cst_114 = arith.constant 0.000000e+00 : f32
    %196 = vector.broadcast %cst_114 : f32 to vector<4x256xf32>
    %197 = arith.maximumf %195, %196 : vector<4x256xf32>
    %c0_115 = arith.constant 0 : index
    %c17_116 = arith.constant 17 : index
    %198 = vector.load %arg11[%c0_115, %c17_116] : memref<4x290xf32, #tpu.memory_space<vmem>>, vector<4x256xf32>
    tpu.vector_store %arg11[%c0_115, %c17_116], %197 {strides = array<i32>} : memref<4x290xf32, #tpu.memory_space<vmem>>, vector<4x256xf32>,
    %c0_117 = arith.constant 0 : index
    %c0_118 = arith.constant 0 : index
    %199 = vector.load %arg11[%c0_117, %c0_118] : memref<4x290xf32, #tpu.memory_space<vmem>>, vector<4x256xf32>
    %200 = vector.broadcast %0 : vector<1x256xf32> to vector<4x256xf32>
    %201 = arith.mulf %199, %200 : vector<4x256xf32>
    %c0_119 = arith.constant 0 : index
    %c0_120 = arith.constant 0 : index
    %c0_121 = arith.constant 0 : index
    %202 = vector.load %arg7[%c0_119, %c0_120, %c0_121] : memref<9x4x4xf32, #tpu.memory_space<vmem>>, vector<1x4x4xf32>
    %203 = vector.shape_cast %202 : vector<1x4x4xf32> to vector<4x4xf32>
    %cst_122 = arith.constant dense<0.000000e+00> : vector<4x256xf32>
    %204 = tpu.matmul %203, %201, %cst_122 {dimension_numbers = #tpu.dot_dimension_numbers<[1], [0], [0], [1], [0, 0, 1, 1], [], []>} : vector<4x4xf32>, vector<4x256xf32>, vector<4x256xf32> -> vector<4x256xf32>
    %c0_123 = arith.constant 0 : index
    %c1_124 = arith.constant 1 : index
    %205 = vector.load %arg11[%c0_123, %c1_124] : memref<4x290xf32, #tpu.memory_space<vmem>>, vector<4x256xf32>
    %c1_125 = arith.constant 1 : index
    %c0_126 = arith.constant 0 : index
    %c0_127 = arith.constant 0 : index
    %206 = vector.load %arg7[%c1_125, %c0_126, %c0_127] : memref<9x4x4xf32, #tpu.memory_space<vmem>>, vector<1x4x4xf32>
    %207 = vector.shape_cast %206 : vector<1x4x4xf32> to vector<4x4xf32>
    %cst_128 = arith.constant dense<0.000000e+00> : vector<4x256xf32>
    %208 = tpu.matmul %207, %205, %cst_128 {dimension_numbers = #tpu.dot_dimension_numbers<[1], [0], [0], [1], [0, 0, 1, 1], [], []>} : vector<4x4xf32>, vector<4x256xf32>, vector<4x256xf32> -> vector<4x256xf32>
    %209 = arith.addf %204, %208 : vector<4x256xf32>
    %c0_129 = arith.constant 0 : index
    %c2_130 = arith.constant 2 : index
    %210 = vector.load %arg11[%c0_129, %c2_130] : memref<4x290xf32, #tpu.memory_space<vmem>>, vector<4x256xf32>
    %211 = vector.broadcast %1 : vector<1x256xf32> to vector<4x256xf32>
    %212 = arith.mulf %210, %211 : vector<4x256xf32>
    %c2_131 = arith.constant 2 : index
    %c0_132 = arith.constant 0 : index
    %c0_133 = arith.constant 0 : index
    %213 = vector.load %arg7[%c2_131, %c0_132, %c0_133] : memref<9x4x4xf32, #tpu.memory_space<vmem>>, vector<1x4x4xf32>
    %214 = vector.shape_cast %213 : vector<1x4x4xf32> to vector<4x4xf32>
    %cst_134 = arith.constant dense<0.000000e+00> : vector<4x256xf32>
    %215 = tpu.matmul %214, %212, %cst_134 {dimension_numbers = #tpu.dot_dimension_numbers<[1], [0], [0], [1], [0, 0, 1, 1], [], []>} : vector<4x4xf32>, vector<4x256xf32>, vector<4x256xf32> -> vector<4x256xf32>
    %216 = arith.addf %209, %215 : vector<4x256xf32>
    %c0_135 = arith.constant 0 : index
    %c16_136 = arith.constant 16 : index
    %217 = vector.load %arg11[%c0_135, %c16_136] : memref<4x290xf32, #tpu.memory_space<vmem>>, vector<4x256xf32>
    %218 = vector.broadcast %0 : vector<1x256xf32> to vector<4x256xf32>
    %219 = arith.mulf %217, %218 : vector<4x256xf32>
    %c3_137 = arith.constant 3 : index
    %c0_138 = arith.constant 0 : index
    %c0_139 = arith.constant 0 : index
    %220 = vector.load %arg7[%c3_137, %c0_138, %c0_139] : memref<9x4x4xf32, #tpu.memory_space<vmem>>, vector<1x4x4xf32>
    %221 = vector.shape_cast %220 : vector<1x4x4xf32> to vector<4x4xf32>
    %cst_140 = arith.constant dense<0.000000e+00> : vector<4x256xf32>
    %222 = tpu.matmul %221, %219, %cst_140 {dimension_numbers = #tpu.dot_dimension_numbers<[1], [0], [0], [1], [0, 0, 1, 1], [], []>} : vector<4x4xf32>, vector<4x256xf32>, vector<4x256xf32> -> vector<4x256xf32>
    %223 = arith.addf %216, %222 : vector<4x256xf32>
    %c0_141 = arith.constant 0 : index
    %c17_142 = arith.constant 17 : index
    %224 = vector.load %arg11[%c0_141, %c17_142] : memref<4x290xf32, #tpu.memory_space<vmem>>, vector<4x256xf32>
    %c4_143 = arith.constant 4 : index
    %c0_144 = arith.constant 0 : index
    %c0_145 = arith.constant 0 : index
    %225 = vector.load %arg7[%c4_143, %c0_144, %c0_145] : memref<9x4x4xf32, #tpu.memory_space<vmem>>, vector<1x4x4xf32>
    %226 = vector.shape_cast %225 : vector<1x4x4xf32> to vector<4x4xf32>
    %cst_146 = arith.constant dense<0.000000e+00> : vector<4x256xf32>
    %227 = tpu.matmul %226, %224, %cst_146 {dimension_numbers = #tpu.dot_dimension_numbers<[1], [0], [0], [1], [0, 0, 1, 1], [], []>} : vector<4x4xf32>, vector<4x256xf32>, vector<4x256xf32> -> vector<4x256xf32>
    %228 = arith.addf %223, %227 : vector<4x256xf32>
    %c0_147 = arith.constant 0 : index
    %c18_148 = arith.constant 18 : index
    %229 = vector.load %arg11[%c0_147, %c18_148] : memref<4x290xf32, #tpu.memory_space<vmem>>, vector<4x256xf32>
    %230 = vector.broadcast %1 : vector<1x256xf32> to vector<4x256xf32>
    %231 = arith.mulf %229, %230 : vector<4x256xf32>
    %c5_149 = arith.constant 5 : index
    %c0_150 = arith.constant 0 : index
    %c0_151 = arith.constant 0 : index
    %232 = vector.load %arg7[%c5_149, %c0_150, %c0_151] : memref<9x4x4xf32, #tpu.memory_space<vmem>>, vector<1x4x4xf32>
    %233 = vector.shape_cast %232 : vector<1x4x4xf32> to vector<4x4xf32>
    %cst_152 = arith.constant dense<0.000000e+00> : vector<4x256xf32>
    %234 = tpu.matmul %233, %231, %cst_152 {dimension_numbers = #tpu.dot_dimension_numbers<[1], [0], [0], [1], [0, 0, 1, 1], [], []>} : vector<4x4xf32>, vector<4x256xf32>, vector<4x256xf32> -> vector<4x256xf32>
    %235 = arith.addf %228, %234 : vector<4x256xf32>
    %c0_153 = arith.constant 0 : index
    %c32_154 = arith.constant 32 : index
    %236 = vector.load %arg11[%c0_153, %c32_154] : memref<4x290xf32, #tpu.memory_space<vmem>>, vector<4x256xf32>
    %237 = vector.broadcast %0 : vector<1x256xf32> to vector<4x256xf32>
    %238 = arith.mulf %236, %237 : vector<4x256xf32>
    %c6_155 = arith.constant 6 : index
    %c0_156 = arith.constant 0 : index
    %c0_157 = arith.constant 0 : index
    %239 = vector.load %arg7[%c6_155, %c0_156, %c0_157] : memref<9x4x4xf32, #tpu.memory_space<vmem>>, vector<1x4x4xf32>
    %240 = vector.shape_cast %239 : vector<1x4x4xf32> to vector<4x4xf32>
    %cst_158 = arith.constant dense<0.000000e+00> : vector<4x256xf32>
    %241 = tpu.matmul %240, %238, %cst_158 {dimension_numbers = #tpu.dot_dimension_numbers<[1], [0], [0], [1], [0, 0, 1, 1], [], []>} : vector<4x4xf32>, vector<4x256xf32>, vector<4x256xf32> -> vector<4x256xf32>
    %242 = arith.addf %235, %241 : vector<4x256xf32>
    %c0_159 = arith.constant 0 : index
    %c33_160 = arith.constant 33 : index
    %243 = vector.load %arg11[%c0_159, %c33_160] : memref<4x290xf32, #tpu.memory_space<vmem>>, vector<4x256xf32>
    %c7_161 = arith.constant 7 : index
    %c0_162 = arith.constant 0 : index
    %c0_163 = arith.constant 0 : index
    %244 = vector.load %arg7[%c7_161, %c0_162, %c0_163] : memref<9x4x4xf32, #tpu.memory_space<vmem>>, vector<1x4x4xf32>
    %245 = vector.shape_cast %244 : vector<1x4x4xf32> to vector<4x4xf32>
    %cst_164 = arith.constant dense<0.000000e+00> : vector<4x256xf32>
    %246 = tpu.matmul %245, %243, %cst_164 {dimension_numbers = #tpu.dot_dimension_numbers<[1], [0], [0], [1], [0, 0, 1, 1], [], []>} : vector<4x4xf32>, vector<4x256xf32>, vector<4x256xf32> -> vector<4x256xf32>
    %247 = arith.addf %242, %246 : vector<4x256xf32>
    %c0_165 = arith.constant 0 : index
    %c34_166 = arith.constant 34 : index
    %248 = vector.load %arg11[%c0_165, %c34_166] : memref<4x290xf32, #tpu.memory_space<vmem>>, vector<4x256xf32>
    %249 = vector.broadcast %1 : vector<1x256xf32> to vector<4x256xf32>
    %250 = arith.mulf %248, %249 : vector<4x256xf32>
    %c8_167 = arith.constant 8 : index
    %c0_168 = arith.constant 0 : index
    %c0_169 = arith.constant 0 : index
    %251 = vector.load %arg7[%c8_167, %c0_168, %c0_169] : memref<9x4x4xf32, #tpu.memory_space<vmem>>, vector<1x4x4xf32>
    %252 = vector.shape_cast %251 : vector<1x4x4xf32> to vector<4x4xf32>
    %cst_170 = arith.constant dense<0.000000e+00> : vector<4x256xf32>
    %253 = tpu.matmul %252, %250, %cst_170 {dimension_numbers = #tpu.dot_dimension_numbers<[1], [0], [0], [1], [0, 0, 1, 1], [], []>} : vector<4x4xf32>, vector<4x256xf32>, vector<4x256xf32> -> vector<4x256xf32>
    %254 = arith.addf %247, %253 : vector<4x256xf32>
    %c0_171 = arith.constant 0 : index
    %c0_172 = arith.constant 0 : index
    %255 = vector.load %arg8[%c0_171, %c0_172] : memref<4x1xf32, #tpu.memory_space<vmem>>, vector<4x1xf32>
    %256 = vector.broadcast %255 : vector<4x1xf32> to vector<4x256xf32>
    %257 = arith.addf %254, %256 : vector<4x256xf32>
    %cst_173 = arith.constant 0.000000e+00 : f32
    %258 = vector.broadcast %cst_173 : f32 to vector<4x256xf32>
    %259 = arith.maximumf %257, %258 : vector<4x256xf32>
    %c0_174 = arith.constant 0 : index
    %c0_175 = arith.constant 0 : index
    %c0_176 = arith.constant 0 : index
    %260 = vector.load %arg9[%c0_174, %c0_175, %c0_176] : memref<1x4x256xf32, #tpu.memory_space<vmem>>, vector<1x4x256xf32>
    %261 = vector.shape_cast %260 : vector<1x4x256xf32> to vector<4x256xf32>
    %262 = vector.shape_cast %259 : vector<4x256xf32> to vector<1x4x256xf32>
    tpu.vector_store %arg9[%c0_174, %c0_175, %c0_176], %262 {strides = array<i32>} : memref<1x4x256xf32, #tpu.memory_space<vmem>>, vector<1x4x256xf32>,
    return
  }
  func.func @transform_0(%arg0: i32) -> (i32, i32, i32) {
    %c0_i32 = arith.constant 0 : i32
    %c0_i32_0 = arith.constant 0 : i32
    %c0_i32_1 = arith.constant 0 : i32
    return %arg0, %c0_i32, %c0_i32_0 : i32, i32, i32
  }
  func.func @transform_1(%arg0: i32) -> (i32, i32, i32) {
    %c0_i32 = arith.constant 0 : i32
    %c0_i32_0 = arith.constant 0 : i32
    %c0_i32_1 = arith.constant 0 : i32
    return %arg0, %c0_i32, %c0_i32_0 : i32, i32, i32
  }
  func.func @transform_2(%arg0: i32) -> (i32, i32) {
    %c0_i32 = arith.constant 0 : i32
    %c0_i32_0 = arith.constant 0 : i32
    %c0_i32_1 = arith.constant 0 : i32
    return %c0_i32, %c0_i32_0 : i32, i32
  }
  func.func @transform_3(%arg0: i32) -> (i32, i32) {
    %c0_i32 = arith.constant 0 : i32
    %c0_i32_0 = arith.constant 0 : i32
    %c0_i32_1 = arith.constant 0 : i32
    return %c0_i32, %c0_i32_0 : i32, i32
  }
  func.func @transform_4(%arg0: i32) -> (i32, i32, i32) {
    %c0_i32 = arith.constant 0 : i32
    %c0_i32_0 = arith.constant 0 : i32
    %c0_i32_1 = arith.constant 0 : i32
    %c0_i32_2 = arith.constant 0 : i32
    return %c0_i32, %c0_i32_0, %c0_i32_1 : i32, i32, i32
  }
  func.func @transform_5(%arg0: i32) -> (i32, i32) {
    %c0_i32 = arith.constant 0 : i32
    %c0_i32_0 = arith.constant 0 : i32
    %c0_i32_1 = arith.constant 0 : i32
    return %c0_i32, %c0_i32_0 : i32, i32
  }
  func.func @transform_6(%arg0: i32) -> (i32, i32, i32) {
    %c0_i32 = arith.constant 0 : i32
    %c0_i32_0 = arith.constant 0 : i32
    %c0_i32_1 = arith.constant 0 : i32
    %c0_i32_2 = arith.constant 0 : i32
    return %c0_i32, %c0_i32_0, %c0_i32_1 : i32, i32, i32
  }
  func.func @transform_7(%arg0: i32) -> (i32, i32) {
    %c0_i32 = arith.constant 0 : i32
    %c0_i32_0 = arith.constant 0 : i32
    %c0_i32_1 = arith.constant 0 : i32
    return %c0_i32, %c0_i32_0 : i32, i32
  }
  func.func @transform_8(%arg0: i32) -> (i32, i32, i32) {
    %c0_i32 = arith.constant 0 : i32
    %c0_i32_0 = arith.constant 0 : i32
    %c0_i32_1 = arith.constant 0 : i32
    return %arg0, %c0_i32, %c0_i32_0 : i32, i32, i32
  }
}

</mosaic_0001>

<bundles_post_ra>
// kernel: tpu_custom_call.1
= control target key start
LH: loop header
LB: loop body
LE: loop exit
PB: predicated region body
PF: predicated region fallthrough
CT: control target
= control target key end

     0   :  { %13 = vsyncpa [#allocation5], 0  ;;  %s2704_s0 = inlined_call_operand.vmem [shape: f32[2,32,8], index: 0, kind: input, shape index: {}]   ;;  %s2705_s1 = inlined_call_operand.vmem [shape: f32[2,4,256], index: 1, kind: input, shape index: {}]   ;;  %s2706_s2 = inlined_call_operand.vmem [shape: f32[8,16], index: 2, kind: input, shape index: {}]   ;;  %s2707_s3 = inlined_call_operand.vmem [shape: f32[2,256], index: 3, kind: input, shape index: {}]   ;;  %s2708_s4 = inlined_call_operand.vmem [shape: f32[9,4,8], index: 4, kind: input, shape index: {}]   ;;  %s2709_s5 = inlined_call_operand.vmem [shape: f32[4,1], index: 5, kind: input, shape index: {}]   ;;  %s2710_s6 = inlined_call_operand.vmem [shape: f32[9,4,4], index: 6, kind: input, shape index: {}]   ;;  %s2711_s7 = inlined_call_operand.vmem [shape: f32[4,1], index: 7, kind: input, shape index: {}]   ;;  %s2712_s8 = inlined_call_operand.hbm [shape: f32[2,4,256], index: 8, kind: output, shape index: {}]  }
   0x1   :  { %15 = vsyncpa [#allocation5 + $0x1], 0  ;;  %s2286_s27 = smov 0   ;;  %s2288_s28 = smov 0  }
   0x2   :  { %s2290_s29 = smov 0   ;;  %s2292_s30 = smov 0  }
   0x3 LB: > { %s2307_s9 = sadd.s32 4294967295, %s2216_s30   ;;  %s1958_s10 = sadd.s32 4294967294, %s2216_s30   ;;  %s2216_s30 = sphi %s2292_s30, %s2745_s30   ;;  %s2212_s29 = sphi %s2290_s29, %s2744_s29   ;;  %s2208_s28 = sphi %s2288_s28, %s2743_s28   ;;  %s2204_s27 = sphi %s2286_s27, %s2742_s27  }
   0x4   : > { %s2311_s11 = sadd.s32 1, %s2216_s30   ;;  %s206_s12 = sadd.s32 1, %s2212_s29 }
   0x5   : > { %s203_s13 = ssub.s32 %s2216_s30, %s2311_s11  ;;  %p216_p0 = scmp.ne.s32.totalorder %s2212_s29, %s2208_s28 }
   0x6   : > { %p204_p1 = scmp.eq.s32.totalorder %s203_s13, 0  ;;  %p217_p2 = scmp.eq.s32.totalorder %s2307_s9, 1 }
   0x7   : > { %p222_p3 = scmp.ne.s32.totalorder %s2208_s28, %s2204_s27  ;;  %p223_p4 = scmp.eq.s32.totalorder %s1958_s10, 1 }
   0x8   : > { %s2322_s14 = scalar_select %p204_p1, %s2212_s29, %s206_s12  }
   0x9   : > { %p2324_p5 = por %p217_p2, %p216_p0  ;;  %p2328_p6 = por %p223_p4, %p222_p3 }
   0xa   : > { %p1961_p7 = scmp.ge.s32.totalorder %s2216_s30, 1  ;;  %p275_p8 = scmp.lt.s32.totalorder %s2216_s30, 3 }
   0xc   : > { %p276_p9 = pnand %p1961_p7, %p275_p8 }
   0xd   : > { %p314_p10 = scmp.lt.s32.totalorder (!%p276_p9), %s2307_s9, 1  ;;  %s2218_s12 = smov (!%p276_p9), 17  }
   0xe   : > { %279 = sbr.rel (%p276_p9) target bundleno = 1074 (0x432), region = 52  ;;  %s2219_s13 = smov (!%p276_p9), 49  }
   0xf   : > { %s2220_s17 = smov (!%p276_p9), 33   ;;  %s2221_s18 = smov (!%p276_p9), 81  }
  0x10   : > { %s2225_s22 = smov (!%p276_p9), 97   ;;  %s2226_s25 = smov (!%p276_p9), 2  }
  0x11   : > { %s2717_s23 = smov (!%p276_p9), 112   ;;  %s2719_s26 = smov (!%p276_p9), 95  }
  0x13   : > { %v356_v0 = vld [vmem:[%s2706_s2] sm:$0xff]  ;;  %s315_s19 = scalar_select %p314_p10, %s2307_s9, 1  ;;  %vm357_vm0 = vcmask 64512   ;;  %vm329_vm1 = vcmask 277640   ;;  %vm331_vm2 = vcmask 134144   ;;  %vm327_vm3 = vcmask 138240  }
  0x14   : > { %385 = vmatpush.msra.mxu0 %v356_v0  ;;  %vm348_vm4 = vcmask 1043592   ;;  %vm404_vm5 = vcmask 269452   ;;  %vm417_vm6 = vcmask 400652   ;;  %vm430_vm7 = vcmask 531852  }
  0x15   : > { %s2047_s20 = sshll.u32 %s315_s19, 5  ;;  %s2048_s21 = sshll.u32 %s315_s19, 3  ;;  %vm442_vm8 = vcmask 663052   ;;  %vm454_vm9 = vcmask 794252   ;;  %vm467_vm10 = vcmask 925452   ;;  %vm480_vm11 = vcmask 1048460  }
  0x16   : > { %s318_s24 = scalar_lea.vmem %s2704_s0, %s2047_s20  ;;  %s323_s10 = scalar_lea.vmem %s2705_s1, %s2048_s21  ;;  %vm482_vm12 = vcmask 7172   ;;  %vm494_vm13 = vcmask 138252   ;;  %vm703_vm14 = vcmask 15360   ;;  %vm776_vm15 = vcmask 130048  }
  0x17   : > { %v335_v1 = vld [vmem:[%s323_s10] sm:$0xff]  ;;  %v353_v3 = vld [vmem:[%s318_s24 + $0x8] sm:$0xff]  ;;  %v354_v5 = vld [vmem:[%s318_s24 + $0x10] sm:$0xff]  ;;  %s2222_s19 = smov 113   ;;  %s2223_s20 = smov 65  }
  0x18   : > { %v352_v2 = vld [vmem:[%s318_s24] sm:$0xff]  ;;  %337 = vst [vmem:[#allocation1] ss:$2 sm:$0xff] %v335_v1  ;;  %v355_v6 = vld [vmem:[%s318_s24 + $0x18] sm:$0xff]  ;;  %s2224_s21 = smov 1   ;;  %s2713_s24 = smov 110  }
  0x19   : > { %1968 = vmatmul.msk.f32.vlgmr.msra.gmra.mxu0 %vm357_vm0, %v352_v2  ;;  %s2238_s10 = smov 96  }
  0x1f   : > { %v339_v4 = vld.sshfl [vmem:[#allocation1 + $0x8] sm:$0xff pattern:$0x75316420]  ;;  %v338_v7 = vld.sshfl [vmem:[#allocation1] sm:$0xff pattern:$0x75316420] }
  0x20   : > { %342 = vrot.lane.b32.xlu1 %v339_v4, %s2218_s12  ;;  %340 = vrot.lane.b32.xlu0 %v338_v7, %s2218_s12 }
  0x21   : > { %1969 = vmatmul.msk.f32.gmra.mxu0 %vm357_vm0, %v353_v3 }
  0x29   : > { %1970 = vmatmul.msk.f32.gmra.mxu0 %vm357_vm0, %v354_v5 }
  0x31   : > { %1971 = vmatmul.msk.f32.gmra.mxu0 %vm357_vm0, %v355_v6 }
  0x96   : > { %v387_v8 = vpop.f32.mrf.mxu0 }
  0x97   : > { %v400_v9 = vrot.slane %v387_v8, 4  ;;  %v420_v10 = vmul.f32 0.93333334, %v387_v8  ;;  %v407_v11 = vmul.f32 0.46666667, %v387_v8 }
  0x98   : > { %v419_v12 = vmul.f32 0.06666667, %v387_v8  ;;  %v406_v14 = vmul.f32 0.53333336, %v387_v8  ;;  %v444_v24 = vmul.f32 0.13333334, %v387_v8 }
  0x99   : > { %401 = vrot.lane.b32.xlu1 %v400_v9, %s2218_s12  ;;  %v422_v13 = vrot.slane %v420_v10, 4  ;;  %v409_v15 = vrot.slane %v407_v11, 4  ;;  %v432_v32 = vmul.f32 0.6, %v387_v8 }
  0x9b   : > { %v424_v16 = vadd.f32 %v422_v13, %v419_v12  ;;  %v411_v17 = vadd.f32 %v409_v15, %v406_v14  ;;  %v1967_v13 = vld [vmem:[%s2707_s3 + $0x1] ss:$2 sm:$0x3] }
  0x9c   : > { %v2367_v14 = vperm.slane %v1967_v13, 1  ;;  %v2369_v15 = vperm.slane %v1967_v13, 0 }
  0x9d   : > { %v426_v18 = vrot.slane %v424_v16, 4  ;;  %v413_v20 = vrot.slane %v411_v17, 4  ;;  %v324_v16 = vld [vmem:[%s2707_s3] ss:$2 sm:$0x3] }
  0x9e   : > { %v390_v19 = vpop.f32.mrf.mxu0  ;;  %v2379_v17 = vperm.slane %v324_v16, 1 }
  0x9f   : > { %427 = vrot.lane.b32.xlu0 %v426_v18, %s2219_s13  ;;  %v445_v21 = vmul.f32 0.8666667, %v390_v19  ;;  %v470_v22 = vmul.f32 0.8, %v390_v19  ;;  %414 = vrot.lane.b32.xlu2 %v413_v20, %s2220_s17  ;;  %v433_v23 = vmul.f32 0.4, %v390_v19  ;;  %v343_v20 = vpop.permute.xlu1 %342 }
  0xa0   : > { %v469_v26 = vmul.f32 0.2, %v390_v19  ;;  %v457_v29 = vmul.f32 0.33333334, %v390_v19  ;;  %v456_v39 = vmul.f32 0.6666667, %v390_v19 }
  0xa1   : > { %v447_v25 = vrot.slane %v445_v21, 4  ;;  %v472_v27 = vrot.slane %v470_v22, 4  ;;  %v435_v28 = vrot.slane %v433_v23, 4  ;;  %v496_v41 = vmul.f32 0.26666668, %v390_v19  ;;  %v341_v21 = vpop.permute.xlu0 %340 }
  0xa2   : > { %v459_v36 = vrot.slane %v457_v29, 4  ;;  %v484_v47 = vmul.f32 0.73333335, %v390_v19  ;;  %v2381_v18 = vperm.slane %v324_v16, 0  ;;  %v2231_v19 = vmov 0.0  }
  0xa3   : > { %v449_v30 = vadd.f32 %v447_v25, %v444_v24  ;;  %v474_v31 = vadd.f32 %v472_v27, %v469_v26  ;;  %v437_v35 = vadd.f32 %v435_v28, %v432_v32  ;;  %330 = vst.msk [vmem:[#allocation2 + $0x10] sm:$0xff] %vm329_vm1, %v2231_v19  ;;  %v344_v22 = vsel %vm327_vm3, %v341_v21, %v343_v20 }
  0xa4   : > { %v461_v44 = vadd.f32 %v459_v36, %v456_v39  ;;  %351 = vst.msk [vmem:[#allocation2 + $0x10] sm:$0xf] %vm331_vm2, %v343_v20  ;;  %vm907_vm1 = vcmask 146432  }
  0xa5   : > { %451 = vrot.lane.b32.xlu1 %v449_v30, %s2221_s18  ;;  %v476_v33 = vrot.slane %v474_v31, 4  ;;  %332 = vst.msk [vmem:[#allocation3] sm:$0xf] %vm331_vm2, %v2231_v19 }
  0xa6   : > { %v393_v34 = vpop.f32.mrf.mxu0  ;;  %v463_v52 = vrot.slane %v461_v44, 4  ;;  %328 = vst.msk [vmem:[#allocation2] sm:$0xff] %vm327_vm3, %v2231_v19 }
  0xa7   : > { %477 = vrot.lane.b32.xlu0 %v476_v33, %s2222_s19  ;;  %v497_v37 = vmul.f32 0.73333335, %v393_v34  ;;  %v485_v38 = vmul.f32 0.26666668, %v393_v34  ;;  %439 = vrot.lane.b32.xlu2 %v437_v35, %s2223_s20  ;;  %v520_v40 = vmul.f32 0.6666667, %v393_v34 }
  0xa8   : > { %v508_v45 = vmul.f32 0.2, %v393_v34  ;;  %v519_v48 = vmul.f32 0.33333334, %v393_v34  ;;  %v507_v53 = vmul.f32 0.8, %v393_v34 }
  0xa9   : > { %v499_v42 = vrot.slane %v497_v37, 4  ;;  %v487_v43 = vrot.slane %v485_v38, 4  ;;  %v522_v49 = vrot.slane %v520_v40, 4  ;;  %v531_v62 = vmul.f32 0.8666667, %v393_v34 }
  0xaa   : > { %v510_v54 = vrot.slane %v508_v45, 4  ;;  %v542_v10 = vmul.f32 0.4, %v393_v34  ;;  %349 = vst.msk [vmem:[#allocation2] sm:$0xf] %vm348_vm4, %v341_v21 }
  0xab   : > { %v501_v46 = vadd.f32 %v499_v42, %v496_v41  ;;  %v489_v50 = vadd.f32 %v487_v43, %v484_v47  ;;  %v524_v55 = vadd.f32 %v522_v49, %v519_v48  ;;  %350 = vst [vmem:[#allocation2 + $0x8] sm:$0xf] %v344_v22  ;;  %v592_v21 = vld [vmem:[%s2708_s4] sm:$0xf] }
  0xac   : > { %v512_v60 = vadd.f32 %v510_v54, %v507_v53 }
  0xad   : > { %503 = vrot.lane.b32.xlu1 %v501_v46, %s2218_s12  ;;  %v526_v61 = vrot.slane %v524_v55, 4 }
  0xae   : > { %v396_v51 = vpop.f32.mrf.mxu0  ;;  %v514_v4 = vrot.slane %v512_v60, 4 }
  0xaf   : > { %491 = vrot.lane.b32.xlu0 %v489_v50, %s2224_s21  ;;  %v532_v56 = vmul.f32 0.13333334, %v396_v51  ;;  %464 = vrot.lane.b32.xlu2 %v463_v52, %s2225_s22  ;;  %v566_v57 = vmul.f32 0.53333336, %v396_v51  ;;  %v554_v59 = vmul.f32 0.06666667, %v396_v51 }
  0xb0   : > { %v565_v63 = vmul.f32 0.46666667, %v396_v51  ;;  %v553_v2 = vmul.f32 0.93333334, %v396_v51  ;;  %v543_v5 = vmul.f32 0.6, %v396_v51 }
  0xb1   : > { %v534_v58 = vrot.slane %v532_v56, 4  ;;  %v568_v0 = vrot.slane %v566_v57, 4  ;;  %v556_v3 = vrot.slane %v554_v59, 4 }
  0xb2   : > { %v545_v8 = vrot.slane %v543_v5, 4 }
  0xb3   : > { %v536_v1 = vadd.f32 %v534_v58, %v531_v62  ;;  %v570_v6 = vadd.f32 %v568_v0, %v565_v63  ;;  %v558_v7 = vadd.f32 %v556_v3, %v553_v2 }
  0xb4   : > { %v547_v12 = vadd.f32 %v545_v8, %v542_v10 }
  0xb5   : > { %527 = vrot.lane.b32.xlu1 %v526_v61, %s2219_s13  ;;  %v572_v9 = vrot.slane %v570_v6, 4  ;;  %v560_v11 = vrot.slane %v558_v7, 4  ;;  %s2227_s13 = smov 18  }
  0xb7   : > { %538 = vrot.lane.b32.xlu0 %v536_v1, %s2223_s20  ;;  %515 = vrot.lane.b32.xlu2 %v514_v4, %s2220_s17  ;;  %s2228_s17 = smov 16   ;;  %s2232_s20 = smov 127  }
  0xbd   : > { %573 = vrot.lane.b32.xlu1 %v572_v9, %s2222_s19  ;;  %s2230_s19 = smov 34  }
  0xbf   : > { %561 = vrot.lane.b32.xlu0 %v560_v11, %s2225_s22  ;;  %549 = vrot.lane.b32.xlu2 %v547_v12, %s2221_s18  ;;  %s2229_s18 = smov 32   ;;  %s2715_s22 = smov 111  }
  0xc5   : > { %701 = vrot.lane.b32.xlu1 %v2367_v14, %s2226_s25 }
  0xc7   : > { %699 = vrot.lane.b32.xlu0 %v2369_v15, %s2226_s25  ;;  %579 = vrot.lane.b32.xlu2 %v396_v51, %s2224_s21  ;;  %s2233_s21 = smov 126  }
  0xcd   : > { %903 = vrot.lane.b32.xlu1 %v2369_v15, %s2227_s13 }
  0xcf   : > { %774 = vrot.lane.b32.xlu0 %v2379_v17, %s2228_s17  ;;  %772 = vrot.lane.b32.xlu2 %v2381_v18, %s2228_s17 }
  0xd5   : > { %978 = vrot.lane.b32.xlu1 %v2379_v17, %s2229_s18 }
  0xd7   : > { %976 = vrot.lane.b32.xlu0 %v2381_v18, %s2229_s18  ;;  %905 = vrot.lane.b32.xlu2 %v2367_v14, %s2227_s13 }
  0xdf   : > { %1109 = vrot.lane.b32.xlu0 %v2367_v14, %s2230_s19  ;;  %1107 = vrot.lane.b32.xlu2 %v2369_v15, %s2230_s19 }
  0xf9   : > { %v415_v23 = vpop.permute.xlu2 %414 }
 0x101   : > { %v440_v24 = vpop.permute.xlu2 %439 }
 0x109   : > { %v465_v27 = vpop.permute.xlu2 %464 }
 0x10b   : > { %v402_v25 = vpop.permute.xlu1 %401 }
 0x10c   : > { %405 = vst.msk [vmem:[#allocation2] sm:$0xf0] %vm404_vm5, %v402_v25 }
 0x10d   : > { %418 = vst.msk [vmem:[#allocation2] sm:$0xf0] %vm417_vm6, %v415_v23 }
 0x111   : > { %v428_v26 = vpop.permute.xlu0 %427  ;;  %v516_v30 = vpop.permute.xlu2 %515 }
 0x112   : > { %431 = vst.msk [vmem:[#allocation2] sm:$0xf0] %vm430_vm7, %v428_v26 }
 0x113   : > { %443 = vst.msk [vmem:[#allocation2] sm:$0xf0] %vm442_vm8, %v440_v24 }
 0x117   : > { %v452_v28 = vpop.permute.xlu1 %451 }
 0x118   : > { %455 = vst.msk [vmem:[#allocation2] sm:$0xf0] %vm454_vm9, %v452_v28 }
 0x119   : > { %v478_v29 = vpop.permute.xlu0 %477  ;;  %468 = vst.msk [vmem:[#allocation2] sm:$0xf0] %vm467_vm10, %v465_v27  ;;  %v550_v35 = vpop.permute.xlu2 %549 }
 0x11a   : > { %481 = vst.msk [vmem:[#allocation2] sm:$0xf0] %vm480_vm11, %v478_v29 }
 0x11b   : > { %483 = vst.msk [vmem:[#allocation2 + $0x8] sm:$0xf0] %vm482_vm12, %v478_v29 }
 0x11f   : > { %v504_v31 = vpop.permute.xlu1 %503 }
 0x121   : > { %v492_v32 = vpop.permute.xlu0 %491  ;;  %v2415_v33 = vld [vmem:[#allocation2] sm:$0xff]  ;;  %v580_v39 = vpop.permute.xlu2 %579 }
 0x122   : > { %495 = vst.msk [vmem:[#allocation2 + $0x8] sm:$0xf0] %vm494_vm13, %v492_v32  ;;  %v590_v34 = vmul.f32 %v2381_v18, %v2415_v33  ;;  %v1972_v32 = vld [vmem:[%s2708_s4 + $0x4] sm:$0xf] }
 0x123   : > { %506 = vst.msk [vmem:[#allocation2 + $0x8] sm:$0xf0] %vm404_vm5, %v504_v31  ;;  %vm980_vm5 = vcmask 261120  }
 0x124   : > { %518 = vst.msk [vmem:[#allocation2 + $0x8] sm:$0xf0] %vm417_vm6, %v516_v30  ;;  %671 = vmatpush.msra.mxu3 %v590_v34  ;;  %vm1111_vm6 = vcmask 277504  }
 0x125   : > { %1975 = vmatmul.msk.f32.vlgmr.msra.gmra.mxu3 %vm357_vm0, %v592_v21 }
 0x127   : > { %v528_v36 = vpop.permute.xlu1 %527 }
 0x128   : > { %530 = vst.msk [vmem:[#allocation2 + $0x8] sm:$0xf0] %vm430_vm7, %v528_v36  ;;  %vm605_vm7 = vcmask 1039360  }
 0x129   : > { %v539_v37 = vpop.permute.xlu0 %538  ;;  %v773_v46 = vpop.permute.xlu2 %772 }
 0x12a   : > { %541 = vst.msk [vmem:[#allocation2 + $0x8] sm:$0xf0] %vm442_vm8, %v539_v37  ;;  %v781_v53 = vmul.f32 %v773_v46, %v2415_v33  ;;  %vm722_vm8 = vcmask 1031168  }
 0x12b   : > { %552 = vst.msk [vmem:[#allocation2 + $0x8] sm:$0xf0] %vm454_vm9, %v550_v35  ;;  %vm795_vm9 = vcmask 916480  }
 0x12f   : > { %v574_v38 = vpop.permute.xlu1 %573 }
 0x130   : > { %577 = vst.msk [vmem:[#allocation2 + $0x10] sm:$0xf0] %vm482_vm12, %v574_v38  ;;  %vm2724_vm12 = vcmask 785408  }
 0x131   : > { %582 = vst.msk [vmem:[#allocation2 + $0x10] sm:$0xf0] %vm494_vm13, %v580_v39  ;;  %v562_v40 = vpop.permute.xlu0 %561  ;;  %v906_v57 = vpop.permute.xlu2 %905  ;;  %vm2723_vm13 = vcmask 777216  }
 0x132   : > { %564 = vst.msk [vmem:[#allocation2 + $0x8] sm:$0xf0] %vm467_vm10, %v562_v40  ;;  %vm853_vm10 = vcmask 908288  }
 0x133   : > { %576 = vst.msk [vmem:[#allocation2 + $0x8] sm:$0xf0] %vm480_vm11, %v574_v38  ;;  %v1977_v38 = vld [vmem:[%s2708_s4 + $0x8] sm:$0xf]  ;;  %vm2726_vm11 = vcmask 900096  }
 0x137   : > { %v702_v42 = vpop.permute.xlu1 %701 }
 0x138   : > { %v593_v41 = vld [vmem:[#allocation2 + $0x10] sm:$0xff] }
 0x139   : > { %603 = vrot.lane.b32.xlu2 %v593_v41, %s2232_s20  ;;  %v700_v43 = vpop.permute.xlu0 %699  ;;  %v710_v47 = vmul.f32 %v702_v42, %v593_v41  ;;  %v914_v62 = vmul.f32 %v906_v57, %v593_v41  ;;  %v1108_v7 = vpop.permute.xlu2 %1107 }
 0x13a   : > { %v2430_v44 = vld [vmem:[#allocation2 + $0x8] sm:$0xff]  ;;  %v704_v45 = vsel %vm703_vm14, %v700_v43, %v702_v42  ;;  %v708_v54 = vmul.f32 %v700_v43, %v2415_v33  ;;  %v1116_v20 = vmul.f32 %v1108_v7, %v2415_v33 }
 0x13b   : > { %v709_v48 = vmul.f32 %v704_v45, %v2430_v44  ;;  %v2112_v49 = vpack.i.bf16 %v2430_v44, %v2415_v33  ;;  %v2137_v8 = vpack.i.bf16 %v593_v41, %v2430_v44  ;;  %v591_v36 = vmul.f32 %v2379_v17, %v2430_v44 }
 0x13d   : > { %2113 = vrot.lane.b32.xlu1 %v2112_v49, %s2232_s20  ;;  %v2117_v50 = vpack.i.bf16 %v710_v47, %v709_v48  ;;  %v1983_v47 = vld [vmem:[%s2708_s4 + $0x10] sm:$0xf]  ;;  %v1180_v48 = vld [vmem:[%s2709_s5] sm:$0xf] }
 0x13f   : > { %2118 = vrot.lane.b32.xlu0 %v2117_v50, %s2233_s21  ;;  %v904_v55 = vpop.permute.xlu1 %903 }
 0x140   : > { %v908_v59 = vsel %vm907_vm1, %v904_v55, %v906_v57  ;;  %v912_v4 = vmul.f32 %v904_v55, %v2415_v33 }
 0x141   : > { %v775_v51 = vpop.permute.xlu0 %774  ;;  %v913_v60 = vmul.f32 %v908_v59, %v2430_v44 }
 0x142   : > { %v777_v52 = vsel %vm776_vm15, %v773_v46, %v775_v51  ;;  %v783_v63 = vmul.f32 %v775_v51, %v593_v41  ;;  %v2240_v51 = vmov 0  }
 0x143   : > { %v782_v56 = vmul.f32 %v777_v52, %v2430_v44  ;;  %v2132_v1 = vpack.i.bf16 %v914_v62, %v913_v60  ;;  %2152 = vset.pattern.permute.xlu2 %v2240_v51  ;;  %2153 = vset.pattern.permute.xlu0 %v2240_v51  ;;  %v1986_v60 = vld [vmem:[%s2708_s4 + $0x14] sm:$0xf] }
 0x145   : > { %716 = vrot.lane.b32.xlu1 %v708_v54, %s2233_s21  ;;  %v2127_v58 = vpack.i.bf16 %v782_v56, %v781_v53 }
 0x147   : > { %2123 = vrot.lane.b32.xlu0 %v2112_v49, %s2715_s22  ;;  %2128 = vrot.lane.b32.xlu2 %v2127_v58, %s2717_s23  ;;  %v979_v0 = vpop.permute.xlu1 %978  ;;  %v1980_v58 = vld [vmem:[%s2708_s4 + $0xc] sm:$0xf] }
 0x148   : > { %v987_v5 = vmul.f32 %v979_v0, %v593_v41 }
 0x149   : > { %v977_v61 = vpop.permute.xlu0 %976 }
 0x14a   : > { %v981_v2 = vsel %vm980_vm5, %v977_v61, %v979_v0  ;;  %v985_v13 = vmul.f32 %v977_v61, %v2415_v33 }
 0x14b   : > { %v986_v3 = vmul.f32 %v981_v2, %v2430_v44 }
 0x14d   : > { %793 = vrot.lane.b32.xlu1 %v783_v63, %s2717_s23  ;;  %v2142_v9 = vpack.i.bf16 %v987_v5, %v986_v3 }
 0x14f   : > { %2133 = vrot.lane.b32.xlu0 %v2132_v1, %s2713_s24  ;;  %851 = vrot.lane.b32.xlu2 %v593_v41, %s2715_s22 }
 0x151   : > { %v1110_v6 = vpop.permute.xlu0 %1109 }
 0x152   : > { %v1112_v10 = vsel %vm1111_vm6, %v1108_v7, %v1110_v6  ;;  %v1118_v12 = vmul.f32 %v1110_v6, %v593_v41  ;;  %v1992_v6 = vld [vmem:[%s2708_s4 + $0x1c] sm:$0xf] }
 0x153   : > { %v1117_v11 = vmul.f32 %v1112_v10, %v2430_v44 }
 0x155   : > { %920 = vrot.lane.b32.xlu1 %v912_v4, %s2713_s24  ;;  %v2147_v16 = vpack.i.bf16 %v1118_v12, %v1117_v11  ;;  %s2721_s24 = smov 94  }
 0x157   : > { %2138 = vrot.lane.b32.xlu0 %v2137_v8, %s2719_s26  ;;  %2143 = vrot.lane.b32.xlu2 %v2142_v9, %s2238_s10  ;;  %v1989_v8 = vld [vmem:[%s2708_s4 + $0x18] sm:$0xf] }
 0x15d   : > { %993 = vrot.lane.b32.xlu1 %v985_v13, %s2238_s10 }
 0x15f   : > { %1051 = vrot.lane.b32.xlu2 %v2415_v33, %s2719_s26  ;;  %2148 = vrot.lane.b32.xlu0 %v2147_v16, %s2721_s24  ;;  %s311_s26 = sand.u32 1, %s2208_s28  }
 0x165   : > { %1124 = vrot.lane.b32.xlu1 %v1116_v20, %s2721_s24  ;;  %v1995_v20 = vld [vmem:[%s2708_s4 + $0x20] sm:$0xf] }
 0x167   : > { %1183 = vperm.xlu2 %2152, %v1180_v48  }
 0x193   : > { %v604_v22 = vpop.permute.xlu2 %603 }
 0x1a1   : > { %v2129_v23 = vpop.permute.xlu2 %2128 }
 0x1a2   : > { %v2131_v28 = vunpack.i.h.bf16 %v2129_v23  ;;  %v2130_v29 = vunpack.i.l.bf16 %v2129_v23 }
 0x1a4   : > { %v796_v39 = vsel %vm795_vm9, %v2130_v29, %v2131_v28 }
 0x1a8   : > { %v673_v23 = vpop.f32.mrf.mxu3 }
 0x1a9   : > { %v852_v35 = vpop.permute.xlu2 %851 }
 0x1af   : > { %v2114_v24 = vpop.permute.xlu1 %2113 }
 0x1b0   : > { %v2116_v25 = vunpack.i.h.bf16 %v2114_v24  ;;  %v2115_v26 = vunpack.i.l.bf16 %v2114_v24 }
 0x1b1   : > { %v2119_v27 = vpop.permute.xlu0 %2118  ;;  %v2144_v49 = vpop.permute.xlu2 %2143 }
 0x1b2   : > { %v2121_v30 = vunpack.i.h.bf16 %v2119_v27  ;;  %v2120_v31 = vunpack.i.l.bf16 %v2119_v27  ;;  %v606_v33 = vsel %vm605_vm7, %v2115_v26, %v2116_v25  ;;  %v607_v34 = vsel %vm605_vm7, %v2116_v25, %v604_v22 }
 0x1b3   : > { %628 = vmatpush.msra.mxu1 %v606_v33  ;;  %648 = vmatpush.msra.mxu2 %v607_v34  ;;  %v2146_v53 = vunpack.i.h.bf16 %v2144_v49  ;;  %v2145_v54 = vunpack.i.l.bf16 %v2144_v49 }
 0x1b4   : > { %v724_v37 = vsel %vm722_vm8, %v2120_v31, %v2121_v30  ;;  %1973 = vmatmul.msk.f32.vlgmr.msra.gmra.mxu1 %vm357_vm0, %v1972_v32  ;;  %1974 = vmatmul.msk.f32.vlgmr.msra.gmra.mxu2 %vm357_vm0, %v1972_v32  ;;  %v1206_v32 = vrot.slane %v2379_v17, 4 }
 0x1b5   : > { %691 = vmatpush.msrb.mxu1 %v591_v36  ;;  %765 = vmatpush.msrb.mxu3 %v724_v37  ;;  %v1001_v61 = vsel %vm2724_vm12, %v2145_v54, %v2146_v53 }
 0x1b6   : > { %1979 = vmatmul.msk.f32.vlgmr.msrb.gmra.mxu3 %vm357_vm0, %v1977_v38 }
 0x1b7   : > { %818 = vmatpush.msra.mxu1 %v796_v39  ;;  %v717_v40 = vpop.permute.xlu1 %716 }
 0x1b8   : > { %v723_v41 = vsel %vm722_vm8, %v717_v40, %v2120_v31 }
 0x1b9   : > { %v2124_v42 = vpop.permute.xlu0 %2123  ;;  %745 = vmatpush.msrb.mxu2 %v723_v41  ;;  %v1052_v3 = vpop.permute.xlu2 %1051 }
 0x1ba   : > { %v2126_v43 = vunpack.i.h.bf16 %v2124_v42  ;;  %v2125_v44 = vunpack.i.l.bf16 %v2124_v42 }
 0x1bc   : > { %v854_v45 = vsel %vm853_vm10, %v2125_v44, %v2126_v43  ;;  %v855_v46 = vsel %vm853_vm10, %v2126_v43, %v852_v35  ;;  %1976 = vmatmul.msk.f32.vlgmr.msrb.gmra.mxu1 %vm357_vm0, %v592_v21  ;;  %1978 = vmatmul.msk.f32.vlgmr.msrb.gmra.mxu2 %vm357_vm0, %v1977_v38 }
 0x1bd   : > { %876 = vmatpush.msra.mxu3 %v854_v45  ;;  %896 = vmatpush.msrb.mxu1 %v855_v46 }
 0x1be   : > { %1984 = vmatmul.msk.f32.vlgmr.msra.gmra.mxu3 %vm357_vm0, %v1983_v47 }
 0x1bf   : > { %v794_v50 = vpop.permute.xlu1 %793 }
 0x1c0   : > { %v797_v52 = vsel %vm795_vm9, %v2131_v28, %v794_v50  ;;  %v1331_v28 = vrot.slane %v2367_v14, 4 }
 0x1c1   : > { %v2134_v55 = vpop.permute.xlu0 %2133  ;;  %838 = vmatpush.msra.mxu2 %v797_v52 }
 0x1c2   : > { %v2136_v56 = vunpack.i.h.bf16 %v2134_v55  ;;  %v2135_v57 = vunpack.i.l.bf16 %v2134_v55 }
 0x1c4   : > { %v928_v59 = vsel %vm2726_vm11, %v2135_v57, %v2136_v56  ;;  %1981 = vmatmul.msk.f32.vlgmr.msra.gmra.mxu1 %vm357_vm0, %v1980_v58  ;;  %1982 = vmatmul.msk.f32.vlgmr.msra.gmra.mxu2 %vm357_vm0, %v1980_v58 }
 0x1c5   : > { %1042 = vmatpush.msra.mxu1 %v1001_v61  ;;  %969 = vmatpush.msrb.mxu3 %v928_v59 }
 0x1c6   : > { %1988 = vmatmul.msk.f32.vlgmr.msrb.gmra.mxu3 %vm357_vm0, %v1986_v60 }
 0x1c7   : > { %v921_v62 = vpop.permute.xlu1 %920 }
 0x1c8   : > { %v927_v63 = vsel %vm2726_vm11, %v921_v62, %v2135_v57 }
 0x1c9   : > { %v2139_v0 = vpop.permute.xlu0 %2138  ;;  %949 = vmatpush.msrb.mxu2 %v927_v63 }
 0x1ca   : > { %v2141_v1 = vunpack.i.h.bf16 %v2139_v0  ;;  %v2140_v2 = vunpack.i.l.bf16 %v2139_v0 }
 0x1cc   : > { %v1058_v4 = vsel %vm2723_vm13, %v1052_v3, %v2140_v2  ;;  %v1059_v5 = vsel %vm2723_vm13, %v2140_v2, %v2141_v1  ;;  %1985 = vmatmul.msk.f32.vlgmr.msrb.gmra.mxu1 %vm357_vm0, %v1983_v47  ;;  %1987 = vmatmul.msk.f32.vlgmr.msrb.gmra.mxu2 %vm357_vm0, %v1986_v60  ;;  %vm2725_vm13 = vcmask 769024  }
 0x1cd   : > { %1080 = vmatpush.msra.mxu2 %v1058_v4  ;;  %1100 = vmatpush.msra.mxu3 %v1059_v5 }
 0x1ce   : > { %1994 = vmatmul.msk.f32.vlgmr.msra.gmra.mxu3 %vm357_vm0, %v1992_v6 }
 0x1cf   : > { %v994_v7 = vpop.permute.xlu1 %993 }
 0x1d0   : > { %v1000_v9 = vsel %vm2724_vm12, %v994_v7, %v2145_v54  ;;  %vm1193_vm12 = vcmask 1043456   ;;  %v1184_v54 = vpop.permute.xlu2 %1183 }
 0x1d1   : > { %1022 = vmatpush.msrb.mxu0 %v1000_v9  ;;  %v2149_v10 = vpop.permute.xlu0 %2148  ;;  %v1332_v31 = vsel %vm1193_vm12, %v2369_v15, %v1331_v28  ;;  %v1207_v34 = vsel %vm1193_vm12, %v2381_v18, %v1206_v32 }
 0x1d2   : > { %v2151_v11 = vunpack.i.h.bf16 %v2149_v10  ;;  %v2150_v12 = vunpack.i.l.bf16 %v2149_v10  ;;  %1990 = vmatmul.msk.f32.vlgmr.msrb.gmra.mxu0 %vm357_vm0, %v1989_v8  ;;  %1333 = vrot.lane.b32.xlu1 %v1332_v31, %s2226_s25  ;;  %s2730_s25 = smov 111  }
 0x1d3   : > { %1410 = vrot.lane.b32.xlu2 %v1207_v34, %s2228_s17  ;;  %s2732_s17 = smov 94  }
 0x1d4   : > { %v1132_v13 = vsel %vm2725_vm13, %v2150_v12, %v2151_v11  ;;  %1991 = vmatmul.msk.f32.vlgmr.msra.gmra.mxu1 %vm357_vm0, %v1989_v8  ;;  %1993 = vmatmul.msk.f32.vlgmr.msra.gmra.mxu2 %vm357_vm0, %v1992_v6 }
 0x1d5   : > { %1173 = vmatpush.msrb.mxu1 %v1132_v13 }
 0x1d7   : > { %v1125_v16 = vpop.permute.xlu1 %1124 }
 0x1d8   : > { %v1131_v21 = vsel %vm2725_vm13, %v1125_v16, %v2150_v12  ;;  %vm1201_vm13 = vcmask 1047556  }
 0x1d9   : > { %1153 = vmatpush.msra.mxu0 %v1131_v21  ;;  %vm1202_vm11 = vmor %vm1201_vm13, %vm348_vm4 }
 0x1da   : > { %1996 = vmatmul.msk.f32.vlgmr.msra.gmra.mxu0 %vm357_vm0, %v1995_v20  ;;  %1633 = vrot.lane.b32.xlu1 %v1207_v34, %s2229_s18  ;;  %s2733_s18 = smov 95  }
 0x1db   : > { %1779 = vrot.lane.b32.xlu2 %v1332_v31, %s2230_s19 }
 0x1dc   : > { %1997 = vmatmul.msk.f32.vlgmr.msrb.gmra.mxu1 %vm357_vm0, %v1995_v20  ;;  %vm333_vm0 = vcmask 273544  }
 0x1dd   : > { %334 = vst.msk [vmem:[#allocation3 + $0x8] sm:$0xf] %vm333_vm0, %v2231_v19 }
 0x22d   : > { %v1411_v11 = vpop.permute.xlu2 %1410 }
 0x22e   : > { %v1412_v13 = vrot.slane %v1411_v11, 4 }
 0x231   : > { %v630_v22 = vpop.f32.mrf.mxu1 }
 0x232   : > { %v674_v35 = vadd.f32 %v673_v23, %v630_v22 }
 0x237   : > { %v650_v24 = vpop.f32.mrf.mxu2 }
 0x239   : > { %v693_v25 = vpop.f32.mrf.mxu1  ;;  %v767_v26 = vpop.f32.mrf.mxu3 }
 0x23a   : > { %v694_v33 = vadd.f32 %v693_v25, %v650_v24  ;;  %v1413_v25 = vsel %vm776_vm15, %v1412_v13, %v1411_v11 }
 0x23c   : > { %v771_v38 = vadd.f32 %v767_v26, %v694_v33 }
 0x23f   : > { %v747_v27 = vpop.f32.mrf.mxu2 }
 0x240   : > { %v770_v37 = vadd.f32 %v747_v27, %v674_v35 }
 0x241   : > { %v820_v29 = vpop.f32.mrf.mxu1  ;;  %v878_v30 = vpop.f32.mrf.mxu3 }
 0x242   : > { %v843_v15 = vadd.f32 %v820_v29, %v770_v37 }
 0x244   : > { %v901_v43 = vadd.f32 %v878_v30, %v843_v15  ;;  %v1334_v4 = vpop.permute.xlu1 %1333 }
 0x245   : > { %v1335_v5 = vrot.slane %v1334_v4, 4 }
 0x247   : > { %v840_v36 = vpop.f32.mrf.mxu2  ;;  %v1336_v12 = vsel %vm703_vm14, %v1335_v5, %v1334_v4  ;;  %vm2736_vm14 = vcmask 785408  }
 0x248   : > { %v844_v39 = vadd.f32 %v840_v36, %v771_v38  ;;  %vm2737_vm15 = vmmov %vm2736_vm14 }
 0x249   : > { %v898_v14 = vpop.f32.mrf.mxu1  ;;  %v971_v40 = vpop.f32.mrf.mxu3 }
 0x24a   : > { %v902_v41 = vadd.f32 %v898_v14, %v844_v39 }
 0x24c   : > { %v975_v45 = vadd.f32 %v971_v40, %v902_v41  ;;  %v1634_v37 = vpop.permute.xlu1 %1633 }
 0x24d   : > { %v1635_v14 = vrot.slane %v1634_v37, 4 }
 0x24f   : > { %v1024_v42 = vpop.f32.mrf.mxu0  ;;  %v951_v17 = vpop.f32.mrf.mxu2 }
 0x250   : > { %v974_v18 = vadd.f32 %v951_v17, %v901_v43 }
 0x251   : > { %v1044_v44 = vpop.f32.mrf.mxu1  ;;  %v1102_v47 = vpop.f32.mrf.mxu3 }
 0x252   : > { %v1048_v46 = vadd.f32 %v1044_v44, %v975_v45  ;;  %v1047_v48 = vadd.f32 %v1024_v42, %v974_v18  ;;  %v1636_v44 = vsel %vm980_vm5, %v1635_v14, %v1634_v37 }
 0x254   : > { %v1106_v52 = vadd.f32 %v1102_v47, %v1048_v46 }
 0x257   : > { %v1082_v49 = vpop.f32.mrf.mxu2  ;;  %v1155_v50 = vpop.f32.mrf.mxu0 }
 0x258   : > { %v1105_v51 = vadd.f32 %v1082_v49, %v1047_v48  ;;  %v1780_v48 = vpop.permute.xlu2 %1779 }
 0x259   : > { %v1175_v53 = vpop.f32.mrf.mxu1 }
 0x25a   : > { %v1178_v55 = vadd.f32 %v1155_v50, %v1105_v51  ;;  %v1179_v56 = vadd.f32 %v1175_v53, %v1106_v52  ;;  %v1781_v50 = vrot.slane %v1780_v48, 4 }
 0x25c   : > { %v1186_v57 = vadd.f32 %v1184_v54, %v1178_v55  ;;  %v1187_v58 = vadd.f32 %v1184_v54, %v1179_v56  ;;  %v1782_v56 = vsel %vm1111_vm6, %v1781_v50, %v1780_v48  ;;  %vm2740_vm6 = vcmask 777216  }
 0x25e   : > { %v1189_v59 = vmax.f32 %v1187_v58, 0.0  ;;  %v1188_v60 = vmax.f32 %v1186_v57, 0.0 }
 0x260   : > { %v1192_v61 = vrot.slane %v1189_v59, 4 }
 0x262   : > { %v1194_v62 = vsel %vm1193_vm12, %v1188_v60, %v1192_v61 }
 0x263   : > { %1195 = vrot.lane.b32.xlu0 %v1194_v62, %s2218_s12  ;;  %s2729_s12 = smov 112  }
 0x26b   : > { %1556 = vrot.lane.b32.xlu0 %v1332_v31, %s2227_s13  ;;  %s2731_s13 = smov 110  }
 0x2d5   : > { %v1196_v63 = vpop.permute.xlu0 %1195 }
 0x2d6   : > { %v1197_v0 = vrot.slane %v1196_v63, 4 }
 0x2d8   : > { %v1198_v1 = vsel %vm327_vm3, %v1197_v0, %v1196_v63  ;;  %1204 = vst.msk [vmem:[#allocation3 + $0x8] sm:$0xf] %vm331_vm2, %v1197_v0  ;;  %vm1230_vm2 = vcmask 31744   ;;  %vm2734_vm3 = vcmask 900096  }
 0x2d9   : > { %1203 = vst.msk [vmem:[#allocation3] sm:$0xff] %vm1202_vm11, %v1198_v1  ;;  %v1998_v1 = vld [vmem:[%s2710_s6 + $0x4] sm:$0xf]  ;;  %vm2735_vm4 = vmmov %vm2734_vm3 }
 0x2dd   : > { %v1557_v30 = vpop.permute.xlu0 %1556 }
 0x2de   : > { %v1558_v32 = vrot.slane %v1557_v30, 4 }
 0x2df   : > { %v1211_v3 = vld [vmem:[#allocation3 + $0x8] sm:$0xf] }
 0x2e0   : > { %v2549_v2 = vld [vmem:[#allocation3] sm:$0xff]  ;;  %1218 = vst [vmem:[#allocation1 + $0x10] ss:$2 sm:$0xff] %v1211_v3  ;;  %v1330_v6 = vld [vmem:[#allocation3 + $0x8] sm:$0xf]  ;;  %v1559_v39 = vsel %vm907_vm1, %v1558_v32, %v1557_v30  ;;  %vm2738_vm1 = vcmask 769024  }
 0x2e1   : > { %1216 = vst [vmem:[#allocation1] ss:$2 sm:$0xff] %v2549_v2  ;;  %v1209_v19 = vmul.f32 %v1207_v34, %v2549_v2  ;;  %v1340_v7 = vmul.f32 %v1335_v5, %v1330_v6  ;;  %v1409_v16 = vld [vmem:[#allocation3 + $0x8] sm:$0xf]  ;;  %v1339_v20 = vmul.f32 %v1336_v12, %v2549_v2  ;;  %v1416_v26 = vmul.f32 %v1413_v25, %v2549_v2  ;;  %v1210_v6 = vld [vmem:[%s2710_s6] sm:$0xf]  ;;  %vm2739_vm5 = vmmov %vm2738_vm1 }
 0x2e2   : > { %v1417_v23 = vmul.f32 %v1412_v13, %v1409_v16  ;;  %v1486_v27 = vld [vmem:[#allocation3 + $0x8] sm:$0xf]  ;;  %v1562_v15 = vmul.f32 %v1559_v39, %v2549_v2  ;;  %v1639_v18 = vmul.f32 %v1636_v44, %v2549_v2  ;;  %v1785_v57 = vmul.f32 %v1782_v56, %v2549_v2  ;;  %v2012_v16 = vld [vmem:[%s2710_s6 + $0xc] sm:$0xf]  ;;  %v2017_v25 = vld [vmem:[%s2710_s6 + $0x10] sm:$0xf] }
 0x2e3   : > { %v1555_v33 = vld [vmem:[#allocation3 + $0x8] sm:$0xf] }
 0x2e4   : > { %v1563_v34 = vmul.f32 %v1558_v32, %v1555_v33  ;;  %v1632_v40 = vld [vmem:[#allocation3 + $0x8] sm:$0xf] }
 0x2e5   : > { %v1640_v41 = vmul.f32 %v1635_v14, %v1632_v40  ;;  %v1709_v45 = vld [vmem:[#allocation3 + $0x8] sm:$0xf] }
 0x2e6   : > { %v1778_v51 = vld [vmem:[#allocation3 + $0x8] sm:$0xf] }
 0x2e7   : > { %v1221_v10 = vld.sshfl [vmem:[#allocation1 + $0x10] sm:$0xff pattern:$0x75316420]  ;;  %v1786_v52 = vmul.f32 %v1781_v50, %v1778_v51 }
 0x2e8   : > { %v1220_v8 = vld.sshfl [vmem:[#allocation1 + $0x8] sm:$0xff pattern:$0x75316420]  ;;  %v1219_v9 = vld.sshfl [vmem:[#allocation1] sm:$0xff pattern:$0x75316420]  ;;  %1226 = vrot.lane.b32.xlu1 %v1221_v10, %s2232_s20 }
 0x2e9   : > { %1224 = vrot.lane.b32.xlu0 %v1220_v8, %s2232_s20  ;;  %1222 = vrot.lane.b32.xlu2 %v1219_v9, %s2232_s20  ;;  %1279 = vst [vmem:[#allocation1] ss:$2 sm:$0xff] %v1209_v19  ;;  %v2007_v8 = vld [vmem:[%s2710_s6 + $0x8] sm:$0xf] }
 0x2ea   : > { %1347 = vst [vmem:[#allocation1 + $0x10] ss:$2 sm:$0xff] %v1340_v7 }
 0x2f0   : > { %v1280_v21 = vld.sshfl [vmem:[#allocation1] sm:$0xff pattern:$0x75316420]  ;;  %v1281_v22 = vld.sshfl [vmem:[#allocation1 + $0x8] sm:$0xff pattern:$0x75316420] }
 0x2f1   : > { %v1350_v24 = vld.sshfl [vmem:[#allocation1 + $0x10] sm:$0xff pattern:$0x75316420]  ;;  %2003 = vmatpush.msk.msrb.mxu0 %vm1193_vm12, %v1280_v21  ;;  %2005 = vmatpush.msk.msra.mxu1 %vm1193_vm12, %v1281_v22  ;;  %1345 = vst [vmem:[#allocation1] ss:$2 sm:$0xff] %v1339_v20 }
 0x2f2   : > { %1355 = vrot.lane.b32.xlu1 %v1350_v24, %s2233_s21  ;;  %1424 = vst [vmem:[#allocation1 + $0x10] ss:$2 sm:$0xff] %v1417_v23  ;;  %2004 = vmatmul.msk.f32.vlgmr.msrb.gmra.mxu0 %vm1230_vm2, %v1210_v6 }
 0x2f3   : > { %2006 = vmatmul.msk.f32.vlgmr.msra.gmra.mxu1 %vm1230_vm2, %v1210_v6 }
 0x2f8   : > { %v1349_v28 = vld.sshfl [vmem:[#allocation1 + $0x8] sm:$0xff pattern:$0x75316420]  ;;  %v1348_v29 = vld.sshfl [vmem:[#allocation1] sm:$0xff pattern:$0x75316420] }
 0x2f9   : > { %v1427_v31 = vld.sshfl [vmem:[#allocation1 + $0x10] sm:$0xff pattern:$0x75316420]  ;;  %1353 = vrot.lane.b32.xlu0 %v1349_v28, %s2233_s21  ;;  %1351 = vrot.lane.b32.xlu2 %v1348_v29, %s2233_s21  ;;  %1422 = vst [vmem:[#allocation1] ss:$2 sm:$0xff] %v1416_v26 }
 0x2fa   : > { %1432 = vrot.lane.b32.xlu1 %v1427_v31, %s2729_s12  ;;  %1493 = vst [vmem:[#allocation1 + $0x10] ss:$2 sm:$0xff] %v1486_v27  ;;  %v2022_v31 = vld [vmem:[%s2710_s6 + $0x14] sm:$0xf] }
 0x300   : > { %v1426_v35 = vld.sshfl [vmem:[#allocation1 + $0x8] sm:$0xff pattern:$0x75316420]  ;;  %v1425_v36 = vld.sshfl [vmem:[#allocation1] sm:$0xff pattern:$0x75316420] }
 0x301   : > { %v1496_v38 = vld.sshfl [vmem:[#allocation1 + $0x10] sm:$0xff pattern:$0x75316420]  ;;  %1430 = vrot.lane.b32.xlu0 %v1426_v35, %s2729_s12  ;;  %1428 = vrot.lane.b32.xlu2 %v1425_v36, %s2729_s12  ;;  %1491 = vst [vmem:[#allocation1] ss:$2 sm:$0xff] %v2549_v2  ;;  %s1962_s12 = sshll.u32 %s311_s26, 3 }
 0x302   : > { %1501 = vrot.lane.b32.xlu1 %v1496_v38, %s2730_s25  ;;  %1570 = vst [vmem:[#allocation1 + $0x10] ss:$2 sm:$0xff] %v1563_v34  ;;  %v1854_v34 = vld [vmem:[%s2711_s7] sm:$0xf]  ;;  %v2027_v38 = vld [vmem:[%s2710_s6 + $0x18] sm:$0xf] }
 0x303   : > { %s313_s19 = scalar_lea.vmem [#allocation4], %s1962_s12  ;;  %s2174_s12 = scalar_lea.hbm %s2712_s8, 16 }
 0x304   : > { %s1884_s20 = sshll.u32 %s313_s19, 4  ;;  %s1885_s20 = int_to_ptr.vmem [resolvable:$true] %s1884_s20 }
 0x308   : > { %v1495_v42 = vld.sshfl [vmem:[#allocation1 + $0x8] sm:$0xff pattern:$0x75316420]  ;;  %v1494_v17 = vld.sshfl [vmem:[#allocation1] sm:$0xff pattern:$0x75316420] }
 0x309   : > { %v1573_v43 = vld.sshfl [vmem:[#allocation1 + $0x10] sm:$0xff pattern:$0x75316420]  ;;  %1499 = vrot.lane.b32.xlu0 %v1495_v42, %s2730_s25  ;;  %1497 = vrot.lane.b32.xlu2 %v1494_v17, %s2730_s25  ;;  %1568 = vst [vmem:[#allocation1] ss:$2 sm:$0xff] %v1562_v15  ;;  %s2049_s25 = sshll.u32 %s2307_s9, 3 }
 0x30a   : > { %1578 = vrot.lane.b32.xlu1 %v1573_v43, %s2731_s13  ;;  %1647 = vst [vmem:[#allocation1 + $0x10] ss:$2 sm:$0xff] %v1640_v41  ;;  %v2037_v42 = vld [vmem:[%s2710_s6 + $0x20] sm:$0xf]  ;;  %s1871_s9 = scalar_lea.sflag [#allocation5], %s311_s26 }
 0x310   : > { %v1572_v46 = vld.sshfl [vmem:[#allocation1 + $0x8] sm:$0xff pattern:$0x75316420]  ;;  %v1571_v47 = vld.sshfl [vmem:[#allocation1] sm:$0xff pattern:$0x75316420] }
 0x311   : > { %v1650_v49 = vld.sshfl [vmem:[#allocation1 + $0x10] sm:$0xff pattern:$0x75316420]  ;;  %1576 = vrot.lane.b32.xlu0 %v1572_v46, %s2731_s13  ;;  %1574 = vrot.lane.b32.xlu2 %v1571_v47, %s2731_s13  ;;  %1645 = vst [vmem:[#allocation1] ss:$2 sm:$0xff] %v1639_v18 }
 0x312   : > { %1655 = vrot.lane.b32.xlu1 %v1650_v49, %s2238_s10  ;;  %1716 = vst [vmem:[#allocation1 + $0x10] ss:$2 sm:$0xff] %v1709_v45  ;;  %v2032_v46 = vld [vmem:[%s2710_s6 + $0x1c] sm:$0xf] }
 0x318   : > { %v1649_v53 = vld.sshfl [vmem:[#allocation1 + $0x8] sm:$0xff pattern:$0x75316420]  ;;  %v1648_v54 = vld.sshfl [vmem:[#allocation1] sm:$0xff pattern:$0x75316420] }
 0x319   : > { %v1719_v55 = vld.sshfl [vmem:[#allocation1 + $0x10] sm:$0xff pattern:$0x75316420]  ;;  %1653 = vrot.lane.b32.xlu0 %v1649_v53, %s2238_s10  ;;  %1651 = vrot.lane.b32.xlu2 %v1648_v54, %s2238_s10  ;;  %1714 = vst [vmem:[#allocation1] ss:$2 sm:$0xff] %v2549_v2 }
 0x31a   : > { %1793 = vst [vmem:[#allocation1 + $0x10] ss:$2 sm:$0xff] %v1786_v52 }
 0x320   : > { %v1717_v58 = vld.sshfl [vmem:[#allocation1] sm:$0xff pattern:$0x75316420]  ;;  %v1718_v59 = vld.sshfl [vmem:[#allocation1 + $0x8] sm:$0xff pattern:$0x75316420] }
 0x321   : > { %1791 = vst [vmem:[#allocation1] ss:$2 sm:$0xff] %v1785_v57  ;;  %v1796_v60 = vld.sshfl [vmem:[#allocation1 + $0x10] sm:$0xff pattern:$0x75316420] }
 0x322   : > { %1801 = vrot.lane.b32.xlu1 %v1796_v60, %s2732_s17 }
 0x328   : > { %v1795_v61 = vld.sshfl [vmem:[#allocation1 + $0x8] sm:$0xff pattern:$0x75316420]  ;;  %v1794_v62 = vld.sshfl [vmem:[#allocation1] sm:$0xff pattern:$0x75316420] }
 0x329   : > { %1799 = vrot.lane.b32.xlu0 %v1795_v61, %s2732_s17  ;;  %1797 = vrot.lane.b32.xlu2 %v1794_v62, %s2732_s17 }
 0x32a   : > { %1724 = vrot.lane.b32.xlu1 %v1719_v55, %s2733_s18 }
 0x331   : > { %1722 = vrot.lane.b32.xlu0 %v1718_v59, %s2733_s18  ;;  %1720 = vrot.lane.b32.xlu2 %v1717_v58, %s2733_s18  ;;  %s1882_s18 = scalar_lea.hbm %s2712_s8, %s2049_s25 }
 0x332   : > { %s1886_s21 = sshll.u32 %s1882_s18, 4  ;;  %s1887_s21 = int_to_ptr.hbm [resolvable:$true] %s1886_s21 }
 0x333   : > { %s2168_s10 = sshra.s32 %s1887_s21, 4  ;;  %s2169_s10 = int_to_ptr.hbm [resolvable:$true] %s2168_s10 }
 0x334   : > { %s2170_s22 = scalar_lea.hbm %s2169_s10, 8  ;;  %p2175_p0 = scmp.lt.s32.totalorder %s2169_s10, %s2712_s8 }
 0x335   : > { %p2171_p11 = scmp.ne.s32.totalorder %s2169_s10, %s2170_s22  ;;  %p2176_p1 = scmp.lt.s32.totalorder %s2174_s12, %s2170_s22 }
 0x337   : > { %p2172_p12 = pnand %p2171_p11, %p2324_p5  ;;  %p2177_p2 = por %p2176_p1, %p2175_p0 }
 0x339   : > { %1857 = vperm.xlu0 %2153, %v1854_v34   ;;  %p2173_p13 = pneg %p2172_p12 }
 0x33b   : > { %p2178_p3 = pnand %p2177_p2, %p2173_p13 }
 0x343   : > { %v1223_v63 = vpop.permute.xlu2 %1222 }
 0x353   : > { %v1352_v5 = vpop.permute.xlu2 %1351 }
 0x35a   : > { %v1227_v2 = vpop.permute.xlu1 %1226 }
 0x35b   : > { %v1225_v0 = vpop.permute.xlu0 %1224  ;;  %v1429_v9 = vpop.permute.xlu2 %1428 }
 0x35c   : > { %v1228_v3 = vsel %vm605_vm7, %v1223_v63, %v1225_v0  ;;  %v1229_v4 = vsel %vm605_vm7, %v1225_v0, %v1227_v2  ;;  %vm2741_vm7 = vmmov %vm2740_vm6 }
 0x35d   : > { %1999 = vmatpush.msk.msrb.mxu2 %vm1193_vm12, %v1228_v3  ;;  %2001 = vmatpush.msk.msrb.mxu3 %vm1193_vm12, %v1229_v4 }
 0x35e   : > { %2000 = vmatmul.msk.f32.vlgmr.msrb.gmra.mxu2 %vm1230_vm2, %v1998_v1  ;;  %2002 = vmatmul.msk.f32.vlgmr.msrb.gmra.mxu3 %vm1230_vm2, %v1998_v1 }
 0x363   : > { %v1498_v22 = vpop.permute.xlu2 %1497 }
 0x364   : > { %v1356_v19 = vpop.permute.xlu1 %1355 }
 0x36b   : > { %v1354_v7 = vpop.permute.xlu0 %1353  ;;  %v1575_v28 = vpop.permute.xlu2 %1574 }
 0x36c   : > { %v1357_v10 = vsel %vm722_vm8, %v1352_v5, %v1354_v7  ;;  %v1358_v11 = vsel %vm722_vm8, %v1354_v7, %v1356_v19  ;;  %v1433_v12 = vpop.permute.xlu1 %1432 }
 0x36d   : > { %2008 = vmatpush.msk.msra.mxu2 %vm1193_vm12, %v1357_v10  ;;  %2010 = vmatpush.msk.msra.mxu3 %vm1193_vm12, %v1358_v11 }
 0x36e   : > { %2009 = vmatmul.msk.f32.vlgmr.msra.gmra.mxu2 %vm1230_vm2, %v2007_v8  ;;  %2011 = vmatmul.msk.f32.vlgmr.msra.gmra.mxu3 %vm1230_vm2, %v2007_v8 }
 0x36f   : > { %v1306_v54 = vpop.f32.mrf.mxu0 }
 0x370   : > { %v1326_v53 = vpop.f32.mrf.mxu1 }
 0x373   : > { %v1431_v13 = vpop.permute.xlu0 %1430  ;;  %v1652_v35 = vpop.permute.xlu2 %1651 }
 0x374   : > { %v1434_v20 = vsel %vm795_vm9, %v1429_v9, %v1431_v13  ;;  %v1435_v21 = vsel %vm795_vm9, %v1431_v13, %v1433_v12  ;;  %v1502_v23 = vpop.permute.xlu1 %1501 }
 0x375   : > { %2013 = vmatpush.msk.msra.mxu0 %vm1193_vm12, %v1434_v20  ;;  %2015 = vmatpush.msk.msrb.mxu1 %vm1193_vm12, %v1435_v21 }
 0x376   : > { %2016 = vmatmul.msk.f32.vlgmr.msrb.gmra.mxu1 %vm1230_vm2, %v2012_v16  ;;  %2014 = vmatmul.msk.f32.vlgmr.msra.gmra.mxu0 %vm1230_vm2, %v2012_v16 }
 0x37b   : > { %v1500_v24 = vpop.permute.xlu0 %1499 }
 0x37c   : > { %v1503_v26 = vsel %vm853_vm10, %v1498_v22, %v1500_v24  ;;  %v1504_v27 = vsel %vm853_vm10, %v1500_v24, %v1502_v23  ;;  %v1579_v29 = vpop.permute.xlu1 %1578 }
 0x37d   : > { %2018 = vmatpush.msk.msrb.mxu2 %vm1193_vm12, %v1503_v26  ;;  %2020 = vmatpush.msk.msrb.mxu3 %vm1193_vm12, %v1504_v27 }
 0x37e   : > { %2021 = vmatmul.msk.f32.vlgmr.msrb.gmra.mxu3 %vm1230_vm2, %v2017_v25  ;;  %2019 = vmatmul.msk.f32.vlgmr.msrb.gmra.mxu2 %vm1230_vm2, %v2017_v25 }
 0x383   : > { %v1577_v30 = vpop.permute.xlu0 %1576  ;;  %v1798_v40 = vpop.permute.xlu2 %1797 }
 0x384   : > { %v1580_v32 = vsel %vm2734_vm3, %v1575_v28, %v1577_v30  ;;  %v1581_v33 = vsel %vm2735_vm4, %v1577_v30, %v1579_v29  ;;  %v1656_v36 = vpop.permute.xlu1 %1655 }
 0x385   : > { %2023 = vmatpush.msk.msrb.mxu0 %vm1193_vm12, %v1580_v32  ;;  %2025 = vmatpush.msk.msra.mxu1 %vm1193_vm12, %v1581_v33 }
 0x386   : > { %2026 = vmatmul.msk.f32.vlgmr.msra.gmra.mxu1 %vm1230_vm2, %v2022_v31  ;;  %2024 = vmatmul.msk.f32.vlgmr.msrb.gmra.mxu0 %vm1230_vm2, %v2022_v31 }
 0x38b   : > { %v1654_v37 = vpop.permute.xlu0 %1653  ;;  %v1721_v44 = vpop.permute.xlu2 %1720 }
 0x38c   : > { %v1657_v14 = vsel %vm2736_vm14, %v1652_v35, %v1654_v37  ;;  %v1658_v39 = vsel %vm2737_vm15, %v1654_v37, %v1656_v36 }
 0x38d   : > { %2028 = vmatpush.msk.msra.mxu2 %vm1193_vm12, %v1657_v14  ;;  %2030 = vmatpush.msk.msra.mxu3 %vm1193_vm12, %v1658_v39 }
 0x38e   : > { %2031 = vmatmul.msk.f32.vlgmr.msra.gmra.mxu3 %vm1230_vm2, %v2027_v38  ;;  %2029 = vmatmul.msk.f32.vlgmr.msra.gmra.mxu2 %vm1230_vm2, %v2027_v38 }
 0x394   : > { %v1802_v15 = vpop.permute.xlu1 %1801 }
 0x39b   : > { %v1800_v41 = vpop.permute.xlu0 %1799 }
 0x39c   : > { %v1803_v17 = vsel %vm2738_vm1, %v1798_v40, %v1800_v41  ;;  %v1804_v43 = vsel %vm2739_vm5, %v1800_v41, %v1802_v15  ;;  %v1725_v18 = vpop.permute.xlu1 %1724 }
 0x39d   : > { %2038 = vmatpush.msk.msrb.mxu2 %vm1193_vm12, %v1803_v17  ;;  %2040 = vmatpush.msk.msrb.mxu3 %vm1193_vm12, %v1804_v43 }
 0x39e   : > { %2041 = vmatmul.msk.f32.vlgmr.msrb.gmra.mxu3 %vm1230_vm2, %v2037_v42  ;;  %2039 = vmatmul.msk.f32.vlgmr.msrb.gmra.mxu2 %vm1230_vm2, %v2037_v42 }
 0x3a3   : > { %v1723_v45 = vpop.permute.xlu0 %1722 }
 0x3a4   : > { %v1726_v47 = vsel %vm2740_vm6, %v1721_v44, %v1723_v45  ;;  %v1727_v48 = vsel %vm2741_vm7, %v1723_v45, %v1725_v18 }
 0x3a5   : > { %2033 = vmatpush.msk.msra.mxu0 %vm1193_vm12, %v1726_v47  ;;  %2035 = vmatpush.msk.msrb.mxu1 %vm1193_vm12, %v1727_v48 }
 0x3a6   : > { %2036 = vmatmul.msk.f32.vlgmr.msrb.gmra.mxu1 %vm1230_vm2, %v2032_v46  ;;  %2034 = vmatmul.msk.f32.vlgmr.msra.gmra.mxu0 %vm1230_vm2, %v2032_v46 }
 0x3ab   : > { %v1858_v21 = vpop.permute.xlu0 %1857 }
 0x3e1   : > { %v1275_v49 = vpop.f32.mrf.mxu3  ;;  %v1255_v50 = vpop.f32.mrf.mxu2 }
 0x3e2   : > { %v1307_v55 = vadd.f32 %v1306_v54, %v1255_v50  ;;  %v1327_v56 = vadd.f32 %v1326_v53, %v1275_v49 }
 0x3f1   : > { %v1403_v51 = vpop.f32.mrf.mxu3  ;;  %v1383_v52 = vpop.f32.mrf.mxu2 }
 0x3f2   : > { %v1406_v61 = vadd.f32 %v1383_v52, %v1307_v55  ;;  %v1407_v62 = vadd.f32 %v1403_v51, %v1327_v56 }
 0x3f3   : > { %v1480_v59 = vpop.f32.mrf.mxu1  ;;  %v1460_v60 = vpop.f32.mrf.mxu0 }
 0x3f4   : > { %v1483_v63 = vadd.f32 %v1460_v60, %v1406_v61  ;;  %v1484_v0 = vadd.f32 %v1480_v59, %v1407_v62 }
 0x401   : > { %v1549_v57 = vpop.f32.mrf.mxu3  ;;  %v1529_v58 = vpop.f32.mrf.mxu2 }
 0x402   : > { %v1552_v1 = vadd.f32 %v1529_v58, %v1483_v63  ;;  %v1553_v6 = vadd.f32 %v1549_v57, %v1484_v0 }
 0x403   : > { %v1626_v4 = vpop.f32.mrf.mxu1  ;;  %v1606_v5 = vpop.f32.mrf.mxu0 }
 0x404   : > { %v1629_v19 = vadd.f32 %v1606_v5, %v1552_v1  ;;  %v1630_v7 = vadd.f32 %v1626_v4, %v1553_v6 }
 0x411   : > { %v1703_v2 = vpop.f32.mrf.mxu3  ;;  %v1683_v3 = vpop.f32.mrf.mxu2 }
 0x412   : > { %v1707_v8 = vadd.f32 %v1703_v2, %v1630_v7  ;;  %v1706_v9 = vadd.f32 %v1683_v3, %v1629_v19 }
 0x421   : > { %v1849_v10 = vpop.f32.mrf.mxu3  ;;  %v1829_v11 = vpop.f32.mrf.mxu2 }
 0x423   : > { %v1772_v12 = vpop.f32.mrf.mxu1  ;;  %v1752_v13 = vpop.f32.mrf.mxu0 }
 0x424   : > { %v1776_v16 = vadd.f32 %v1772_v12, %v1707_v8  ;;  %v1775_v20 = vadd.f32 %v1752_v13, %v1706_v9 }
 0x426   : > { %v1853_v22 = vadd.f32 %v1849_v10, %v1776_v16  ;;  %v1852_v23 = vadd.f32 %v1829_v11, %v1775_v20 }
 0x428   : > { %v1860_v24 = vadd.f32 %v1858_v21, %v1852_v23  ;;  %v1861_v25 = vadd.f32 %v1858_v21, %v1853_v22 }
 0x42a   : > { %v1863_v26 = vmax.f32 %v1861_v25, 0.0  ;;  %v1862_v27 = vmax.f32 %v1860_v24, 0.0 }
 0x42c   : > { %v1866_v28 = vrot.slane %v1863_v26, 4 }
 0x42e   : > { %v1867_v29 = vsel %vm1193_vm12, %v1862_v27, %v1866_v28 }
 0x42f   : > { %1869 = vst [vmem:[%s313_s19] sm:$0xff] %v1867_v29 }
 0x430   : > { %2181 = shalt.err (!%p2178_p3)
}
 0x431   : > { %2050 = dma.vmem_to_hbm [thread:$0]  (%p2324_p5), %s1885_s20, 128, %s1887_s21, %s1871_s9  }
 0x432 PF: > { %p2056_p4 = scmp.ge.s32.totalorder %s2216_s30, 2  ;;  %s1898_s26 = sand.u32 1, %s2204_s27  }
 0x433   : > { %s1899_s17 = scalar_lea.sflag [#allocation5], %s1898_s26 }
 0x434   : > { %p2053_p7 = pnand %p2056_p4, %p2328_p6 }
 0x436   : > { %p2054_p8 = pneg %p2053_p7 }
 0x438   : > { %2199 = dma.done.wait (%p2054_p8), %s1899_s17, 128  }
 0x439   : > { %2201 = vsyncadd (%p2054_p8), %s1899_s17, 4294967168  ;;  %p18_p9 = scmp.ge.s32.totalorder %s2311_s11, 4   ;;  %s2742_s27 = smov %s2208_s28 }
 0x43a   : > { %s2743_s28 = smov %s2212_s29  ;;  %s2744_s29 = smov %s2322_s14 }
 0x43b   : > { %s2745_s30 = smov %s2311_s11  ;;  %20 = sbr.rel (!%p18_p9) target bundleno = 3 (0x3), region = 115 }
 0x440   :  { %1905 = vsyncpa [#allocation5], 1 }
 0x441   :  { %1907 = vsyncpa [#allocation5 + $0x1], 1 }

</bundles_post_ra>
